<compile_context>
chip_gen: v5e
topology: v5e:2x2
jax: 0.10.0
libtpu: 0.0.40
codegen_flags: <defaults>
</compile_context>

<pallas_src>
import functools
import math

import jax
import jax.numpy as jnp
from jax.experimental import pallas as pl
from jax.experimental.pallas import tpu as pltpu


def _lcm(*nums):
    return int(functools.reduce(lambda a, b: a * b // math.gcd(a, b), nums, 1))


def _softmax_last(x):
    m = jnp.max(x, axis=-1, keepdims=True)
    e = jnp.exp(x - m)
    return e / jnp.sum(e, axis=-1, keepdims=True)


def _row_tile(n, cap=512):
    """Largest divisor of n that is <= cap (row tile for the consensus attention)."""
    best = 1
    for t in range(1, min(n, cap) + 1):
        if n % t == 0:
            best = t
    return best


def _shift_up(x, d):
    """result[n] = x[n + d] (circular along axis 0); d is a static python int."""
    if d == 0:
        return x
    return jnp.concatenate([x[d:], x[:d]], axis=0)


def _shift_down(x, d):
    """result[n] = x[n - d] (circular along axis 0); d is a static python int."""
    if d == 0:
        return x
    return jnp.concatenate([x[-d:], x[:-d]], axis=0)


def _block_mean_repeats(x2d, block_sizes, pos):
    """Yield (bi, block-mean-of-x2d-repeated-to-N-rows) per block size (ascending).

    For block size m the result r satisfies r[n] = mean(x2d[m*(n//m) : m*(n//m)+m]).
    Implemented with shifted adds + phase selects (no reshapes, no matmuls).  The
    length-m forward-windowed sums are built incrementally across ascending sizes, so
    the wrap-around of the circular shifts is never read (block starts <= N - m).
    """
    win = x2d
    cur = 1
    for bi, m in enumerate(block_sizes):
        while cur < m:
            win = win + _shift_up(x2d, cur)
            cur += 1
        if m == 1:
            yield bi, x2d
        else:
            phase = pos % m
            y = win                              # phase-0 rows: win[n] is the block sum
            for p in range(1, m):
                y = jnp.where(phase == p, _shift_down(win, p), y)
            yield bi, y * (1.0 / m)


def gbst_pallas(x, wconv, bconv, wscore, bscore, *, max_block_size, downsample_factor):
    """x: (B, input_dim, L) float32 (PyTorch NCW).  Returns (char_x, x_down)."""
    B, CIN, L = x.shape
    DM = wconv.shape[0]
    K = max_block_size
    DS = downsample_factor
    block_sizes = list(range(1, K + 1))
    NB = len(block_sizes)
    mult = _lcm(*block_sizes)
    N = -(-L // mult) * mult                       # seq len after pad_to_multiple
    m_len = -(-L // DS) * DS                       # DS | mult, so m_len <= N
    n_down = m_len // DS
    TQ = _row_tile(N)                              # attention row tile
    n_tiles = N // TQ
    unroll_attn = n_tiles <= 8                     # static tile starts for short loops

    # ---- glue: layout change + 'same'-conv padding + im2col + weight reshapes -------
    left = (K - 1) // 2                            # PyTorch Conv1d padding='same'
    Lc = N + K - 1
    x_bl = jnp.transpose(x, (0, 2, 1))             # (B, L, CIN)
    x_pad = jnp.pad(x_bl, ((0, 0), (left, Lc - left - L), (0, 0)))          # (B, Lc, CIN)
    xim = jnp.concatenate([x_pad[:, k:k + N, :] for k in range(K)], axis=-1)
    xim = xim.astype(jnp.bfloat16)                 # (B, N, K*CIN) bf16 MXU operand

    w2 = jnp.transpose(wconv, (2, 1, 0)).reshape(K * CIN, DM).astype(jnp.bfloat16)
    bconv_2d = bconv.reshape(1, DM).astype(jnp.float32)
    wscore_2d = wscore.reshape(1, DM).astype(jnp.float32)
    bscore_2d = jnp.asarray(bscore, jnp.float32).reshape(1, 1)

    # ---- Pallas kernel ---------------------------------------------------------------
    def kernel(xim_ref, w2_ref, bconv_ref, wscore_ref, bscore_ref,
               char_ref, down_ref, xw_ref, s_pre_ref, s_post_ref):
        pos = jax.lax.broadcasted_iota(jnp.int32, (N, 1), 0)

        # 1) Conv1d(padding='same') as ONE fused matmul (bf16 operands, f32 accumulate).
        xc = jnp.dot(xim_ref[0], w2_ref[...], preferred_element_type=jnp.float32)
        xc = xc + bconv_ref[...]
        xc = jnp.where(pos < L, xc, 0.0)           # pad_to_multiple of the conv OUTPUT

        # 2) Score projection first (it commutes with the block mean), then block-mean
        #    only the (N, 1) projected column per block size -> scores (N, NB).
        s0 = jnp.sum(xc * wscore_ref[...], axis=1, keepdims=True) + bscore_ref[0, 0]
        cols = [None] * NB
        for bi, col in _block_mean_repeats(s0, block_sizes, pos):
            cols[bi] = col
        scores = _softmax_last(jnp.concatenate(cols, axis=1))       # (N, NB)

        # 3) Score-consensus attention, row-tiled: only a (TQ, N) slab of sim/attn is
        #    live at a time.  bf16 MXU operands, f32 accumulation/softmax.
        s_pre_ref[...] = scores
        scores_all = scores.astype(jnp.bfloat16)

        def att_tile(r0):
            blk = s_pre_ref[pl.ds(r0, TQ), :].astype(jnp.bfloat16)             # (TQ, NB)
            sim = jax.lax.dot_general(blk, scores_all, (((1,), (1,)), ((), ())),
                                      preferred_element_type=jnp.float32)      # (TQ, N)
            attn = _softmax_last(sim).astype(jnp.bfloat16)
            s_post_ref[pl.ds(r0, TQ), :] = jnp.dot(
                attn, scores_all, preferred_element_type=jnp.float32)          # (TQ, NB)

        if unroll_attn:
            for t in range(n_tiles):               # static, aligned tile starts
                att_tile(t * TQ)
        else:
            def att_body(t, carry):
                att_tile(pl.multiple_of(t * TQ, TQ))
                return carry
            jax.lax.fori_loop(0, n_tiles, att_body, 0)

        scores_fin = s_post_ref[...]                                # (N, NB)

        # 4) Weighted sum of block representations; block means of xc are recomputed one
        #    block size at a time so only a single (N, DM) repr is live per step.
        xw = None
        for bi, repr_bi in _block_mean_repeats(xc, block_sizes, pos):
            contrib = repr_bi * scores_fin[:, bi:bi + 1]
            xw = contrib if xw is None else xw + contrib

        # 5) Outputs: lane/sublane-dense (N, DM) char slab; downsample = mean over DS
        #    consecutive rows, done with DS strided-row reads of the xw scratch.
        xw_ref[...] = xw
        char_ref[0] = xw
        acc = xw_ref[pl.ds(0, n_down, stride=DS), :]
        for d in range(1, DS):
            acc = acc + xw_ref[pl.ds(d, n_down, stride=DS), :]
        down_ref[0] = acc * (1.0 / DS)

    out_shapes = (
        jax.ShapeDtypeStruct((B, N, DM), jnp.float32),
        jax.ShapeDtypeStruct((B, n_down, DM), jnp.float32),
    )
    char_full, x_down = pl.pallas_call(
        kernel,
        out_shape=out_shapes,
        grid=(B,),
        in_specs=[
            pl.BlockSpec((1, N, K * CIN), lambda bb: (bb, 0, 0)),
            pl.BlockSpec((K * CIN, DM), lambda bb: (0, 0)),
            pl.BlockSpec((1, DM), lambda bb: (0, 0)),
            pl.BlockSpec((1, DM), lambda bb: (0, 0)),
            pl.BlockSpec((1, 1), lambda bb: (0, 0)),
        ],
        out_specs=(
            pl.BlockSpec((1, N, DM), lambda bb: (bb, 0, 0)),
            pl.BlockSpec((1, n_down, DM), lambda bb: (bb, 0, 0)),
        ),
        scratch_shapes=[
            pltpu.VMEM((N, DM), jnp.float32),      # xw (strided downsample reads)
            pltpu.VMEM((N, NB), jnp.float32),      # pre-attention scores
            pltpu.VMEM((N, NB), jnp.float32),      # post-attention scores
        ],
        compiler_params=pltpu.CompilerParams(dimension_semantics=("parallel",)),
    )(xim, w2, bconv_2d, wscore_2d, bscore_2d)
    return char_full[:, :L], x_down


# ---- pure-JAX reference (for correctness check only, f32 / HIGHEST precision) --------
def gbst_reference(x, wconv, bconv, wscore, bscore, *, max_block_size, downsample_factor):
    B, CIN, L = x.shape
    DM = wconv.shape[0]
    K = max_block_size
    block_sizes = list(range(1, K + 1))
    mult = _lcm(*block_sizes)
    N = -(-L // mult) * mult
    m_len = -(-L // downsample_factor) * downsample_factor
    left = (K - 1) // 2
    right = (K - 1) - left
    hp = jax.lax.Precision.HIGHEST

    xp = jnp.pad(x, ((0, 0), (0, 0), (left, right)))
    xc = jnp.zeros((B, L, DM), jnp.float32) + bconv[None, None, :]
    for k in range(K):
        xc = xc + jnp.einsum('bcl,oc->blo', xp[:, :, k:k + L], wconv[:, :, k], precision=hp)
    xc = jnp.pad(xc, ((0, 0), (0, N - L), (0, 0)))

    reprs = []
    for m in block_sizes:
        r = xc.reshape(B, N // m, m, DM).mean(axis=2)
        reprs.append(jnp.repeat(r, m, axis=1))
    br = jnp.stack(reprs, axis=2)                               # (B, N, NB, DM)
    scores = jnp.einsum('bnkd,d->bnk', br, wscore, precision=hp) + bscore
    scores = jax.nn.softmax(scores, axis=2)
    sim = jnp.einsum('bik,bjk->bij', scores, scores, precision=hp)
    attn = jax.nn.softmax(sim, axis=-1)
    scores = jnp.einsum('bij,bjk->bik', attn, scores, precision=hp)
    xw = (br * scores[..., None]).sum(axis=2)                   # (B, N, DM)
    char_x = xw[:, :m_len]
    down = char_x.reshape(B, m_len // downsample_factor, downsample_factor, DM).mean(axis=2)
    return char_x[:, :L], down


if __name__ == "__main__":
    B, CIN, L = 2, 4, 16          # batch, input_dim, seq_len
    DM, K, DS = 32, 4, 4          # d_model, max_block_size, downsample_factor

    key = jax.random.PRNGKey(0)
    k1, k2, k3, k4, k5 = jax.random.split(key, 5)
    wconv = jax.random.normal(k1, (DM, CIN, K), jnp.float32) / math.sqrt(CIN * K)
    bconv = jax.random.normal(k2, (DM,), jnp.float32) * 0.1
    wscore = jax.random.normal(k3, (DM,), jnp.float32) / math.sqrt(DM)
    bscore = jax.random.normal(k4, (), jnp.float32) * 0.1
    x = jax.random.normal(k5, (B, CIN, L), jnp.float32)

    char_pl, down_pl = jax.block_until_ready(
        gbst_pallas(x, wconv, bconv, wscore, bscore,
                    max_block_size=K, downsample_factor=DS))

    char_rf, down_rf = gbst_reference(x, wconv, bconv, wscore, bscore,
                                      max_block_size=K, downsample_factor=DS)

    assert char_pl.shape == (B, L, DM) and down_pl.shape == (B, L // DS, DM)
    err_c = float(jnp.max(jnp.abs(char_pl - char_rf)))
    err_d = float(jnp.max(jnp.abs(down_pl - down_rf)))
    # bf16 MXU operands (with f32 accumulation) introduce up to ~1e-2 abs error at
    # these magnitudes; the reference is pure f32 HIGHEST.
    if err_c > 3e-2 or err_d > 3e-2:
        raise AssertionError(f"mismatch vs reference: char={err_c} down={err_d}")
    print("KERNEL_OK")
</pallas_src>

<mosaic_0001>
module attributes {stable_mosaic.version = 11 : i64} {
  func.func @kernel(%arg0: i32, %arg1: memref<1x24x16xbf16, #tpu.memory_space<vmem>>, %arg2: memref<16x32xbf16, #tpu.memory_space<vmem>>, %arg3: memref<1x32xf32, #tpu.memory_space<vmem>>, %arg4: memref<1x32xf32, #tpu.memory_space<vmem>>, %arg5: memref<1x1xf32, #tpu.memory_space<vmem>>, %arg6: memref<1x24x32xf32, #tpu.memory_space<vmem>>, %arg7: memref<1x4x32xf32, #tpu.memory_space<vmem>>, %arg8: memref<24x32xf32, #tpu.memory_space<vmem>>, %arg9: memref<24x4xf32, #tpu.memory_space<vmem>>, %arg10: memref<24x4xf32, #tpu.memory_space<vmem>>) attributes {dimension_semantics = [#tpu.dimension_semantics<parallel>], iteration_bounds = array<i64: 2>, scalar_prefetch = 0 : i64, scratch_operands = 3 : i64, tpu.core_type = #tpu.core_type<tc>, window_params = [{transform_indices = @transform_0, window_bounds = array<i64: 1, 24, 16>}, {pipeline_mode = #tpu.pipeline_mode<synchronous>, transform_indices = @transform_1, window_bounds = array<i64: 16, 32>}, {pipeline_mode = #tpu.pipeline_mode<synchronous>, transform_indices = @transform_2, window_bounds = array<i64: 1, 32>}, {pipeline_mode = #tpu.pipeline_mode<synchronous>, transform_indices = @transform_3, window_bounds = array<i64: 1, 32>}, {pipeline_mode = #tpu.pipeline_mode<synchronous>, transform_indices = @transform_4, window_bounds = array<i64: 1, 1>}, {transform_indices = @transform_5, window_bounds = array<i64: 1, 24, 32>}, {transform_indices = @transform_6, window_bounds = array<i64: 1, 4, 32>}]} {
    %0 = tpu.iota {dimensions = array<i32: 0>} : vector<24x1xi32>
    %c0 = arith.constant 0 : index
    %c0_0 = arith.constant 0 : index
    %c0_1 = arith.constant 0 : index
    %1 = vector.load %arg1[%c0, %c0_0, %c0_1] : memref<1x24x16xbf16, #tpu.memory_space<vmem>>, vector<1x24x16xbf16>
    %2 = vector.shape_cast %1 : vector<1x24x16xbf16> to vector<24x16xbf16>
    %c0_2 = arith.constant 0 : index
    %c0_3 = arith.constant 0 : index
    %3 = vector.load %arg2[%c0_2, %c0_3] : memref<16x32xbf16, #tpu.memory_space<vmem>>, vector<16x32xbf16>
    %cst = arith.constant dense<0.000000e+00> : vector<24x32xf32>
    %4 = tpu.matmul %2, %3, %cst {dimension_numbers = #tpu.dot_dimension_numbers<[1], [0], [0], [1], [0, 0, 1, 1], [], []>} : vector<24x16xbf16>, vector<16x32xbf16>, vector<24x32xf32> -> vector<24x32xf32>
    %c0_4 = arith.constant 0 : index
    %c0_5 = arith.constant 0 : index
    %5 = vector.load %arg3[%c0_4, %c0_5] : memref<1x32xf32, #tpu.memory_space<vmem>>, vector<1x32xf32>
    %6 = vector.broadcast %5 : vector<1x32xf32> to vector<24x32xf32>
    %7 = arith.addf %4, %6 : vector<24x32xf32>
    %c16_i32 = arith.constant 16 : i32
    %8 = vector.broadcast %c16_i32 : i32 to vector<24x1xi32>
    %9 = arith.cmpi slt, %0, %8 : vector<24x1xi32>
    %cst_6 = arith.constant 0.000000e+00 : f32
    %10 = vector.shape_cast %9 : vector<24x1xi1> to vector<24x1xi1>
    %11 = vector.broadcast %10 : vector<24x1xi1> to vector<24x32xi1>
    %12 = vector.broadcast %cst_6 : f32 to vector<24x32xf32>
    %13 = arith.select %11, %7, %12 : vector<24x32xi1>, vector<24x32xf32>
    %c0_7 = arith.constant 0 : index
    %c0_8 = arith.constant 0 : index
    %14 = vector.load %arg4[%c0_7, %c0_8] : memref<1x32xf32, #tpu.memory_space<vmem>>, vector<1x32xf32>
    %15 = vector.broadcast %14 : vector<1x32xf32> to vector<24x32xf32>
    %16 = arith.mulf %13, %15 : vector<24x32xf32>
    %cst_9 = arith.constant dense<0.000000e+00> : vector<24xf32>
    %17 = vector.multi_reduction <add>, %16, %cst_9 [1] : vector<24x32xf32> to vector<24xf32>
    %18 = vector.shape_cast %17 : vector<24xf32> to vector<24x1xf32>
    %c0_10 = arith.constant 0 : index
    %c0_11 = arith.constant 0 : index
    %19 = vector.load %arg5[%c0_10, %c0_11] : memref<1x1xf32, #tpu.memory_space<vmem>>, vector<1x1xf32>
    %20 = vector.extract %19[0, 0] : f32 from vector<1x1xf32>
    %21 = vector.broadcast %20 : f32 to vector<24x1xf32>
    %22 = arith.addf %18, %21 : vector<24x1xf32>
    %23 = vector.extract_strided_slice %22 {offsets = [1, 0], sizes = [23, 1], strides = [1, 1]} : vector<24x1xf32> to vector<23x1xf32>
    %24 = vector.extract_strided_slice %22 {offsets = [0, 0], sizes = [1, 1], strides = [1, 1]} : vector<24x1xf32> to vector<1x1xf32>
    %25 = tpu.concatenate %23, %24 in 0 : vector<23x1xf32>, vector<1x1xf32> -> vector<24x1xf32>
    %26 = arith.addf %22, %25 : vector<24x1xf32>
    %c2_i32 = arith.constant 2 : i32
    %c0_i32 = arith.constant 0 : i32
    %27 = arith.cmpi eq, %c2_i32, %c0_i32 : i32
    %c1_i32 = arith.constant 1 : i32
    %28 = arith.select %27, %c1_i32, %c2_i32 : i32
    %29 = vector.broadcast %28 : i32 to vector<24x1xi32>
    %30 = arith.remsi %0, %29 : vector<24x1xi32>
    %c0_i32_12 = arith.constant 0 : i32
    %31 = vector.broadcast %c0_i32_12 : i32 to vector<24x1xi32>
    %32 = arith.cmpi ne, %30, %31 : vector<24x1xi32>
    %c0_i32_13 = arith.constant 0 : i32
    %33 = vector.broadcast %c0_i32_13 : i32 to vector<24x1xi32>
    %34 = arith.cmpi slt, %30, %33 : vector<24x1xi32>
    %c0_i32_14 = arith.constant 0 : i32
    %35 = arith.cmpi slt, %28, %c0_i32_14 : i32
    %36 = vector.broadcast %35 : i1 to vector<24x1xi1>
    %37 = vector.broadcast %36 : vector<24x1xi1> to vector<24x1xi1>
    %38 = arith.xori %34, %37 : vector<24x1xi1>
    %39 = arith.andi %38, %32 : vector<24x1xi1>
    %40 = vector.broadcast %28 : i32 to vector<24x1xi32>
    %41 = arith.addi %30, %40 : vector<24x1xi32>
    %42 = arith.select %39, %41, %30 : vector<24x1xi1>, vector<24x1xi32>
    %c1_i32_15 = arith.constant 1 : i32
    %43 = vector.broadcast %c1_i32_15 : i32 to vector<24x1xi32>
    %44 = arith.cmpi eq, %42, %43 : vector<24x1xi32>
    %45 = vector.extract_strided_slice %26 {offsets = [23, 0], sizes = [1, 1], strides = [1, 1]} : vector<24x1xf32> to vector<1x1xf32>
    %46 = vector.extract_strided_slice %26 {offsets = [0, 0], sizes = [23, 1], strides = [1, 1]} : vector<24x1xf32> to vector<23x1xf32>
    %47 = tpu.concatenate %45, %46 in 0 : vector<1x1xf32>, vector<23x1xf32> -> vector<24x1xf32>
    %48 = arith.select %44, %47, %26 : vector<24x1xi1>, vector<24x1xf32>
    %cst_16 = arith.constant 5.000000e-01 : f32
    %49 = vector.broadcast %cst_16 : f32 to vector<24x1xf32>
    %50 = arith.mulf %48, %49 : vector<24x1xf32>
    %51 = vector.extract_strided_slice %22 {offsets = [2, 0], sizes = [22, 1], strides = [1, 1]} : vector<24x1xf32> to vector<22x1xf32>
    %52 = vector.extract_strided_slice %22 {offsets = [0, 0], sizes = [2, 1], strides = [1, 1]} : vector<24x1xf32> to vector<2x1xf32>
    %53 = tpu.concatenate %51, %52 in 0 : vector<22x1xf32>, vector<2x1xf32> -> vector<24x1xf32>
    %54 = arith.addf %26, %53 : vector<24x1xf32>
    %c3_i32 = arith.constant 3 : i32
    %c0_i32_17 = arith.constant 0 : i32
    %55 = arith.cmpi eq, %c3_i32, %c0_i32_17 : i32
    %c1_i32_18 = arith.constant 1 : i32
    %56 = arith.select %55, %c1_i32_18, %c3_i32 : i32
    %57 = vector.broadcast %56 : i32 to vector<24x1xi32>
    %58 = arith.remsi %0, %57 : vector<24x1xi32>
    %c0_i32_19 = arith.constant 0 : i32
    %59 = vector.broadcast %c0_i32_19 : i32 to vector<24x1xi32>
    %60 = arith.cmpi ne, %58, %59 : vector<24x1xi32>
    %c0_i32_20 = arith.constant 0 : i32
    %61 = vector.broadcast %c0_i32_20 : i32 to vector<24x1xi32>
    %62 = arith.cmpi slt, %58, %61 : vector<24x1xi32>
    %c0_i32_21 = arith.constant 0 : i32
    %63 = arith.cmpi slt, %56, %c0_i32_21 : i32
    %64 = vector.broadcast %63 : i1 to vector<24x1xi1>
    %65 = vector.broadcast %64 : vector<24x1xi1> to vector<24x1xi1>
    %66 = arith.xori %62, %65 : vector<24x1xi1>
    %67 = arith.andi %66, %60 : vector<24x1xi1>
    %68 = vector.broadcast %56 : i32 to vector<24x1xi32>
    %69 = arith.addi %58, %68 : vector<24x1xi32>
    %70 = arith.select %67, %69, %58 : vector<24x1xi1>, vector<24x1xi32>
    %c1_i32_22 = arith.constant 1 : i32
    %71 = vector.broadcast %c1_i32_22 : i32 to vector<24x1xi32>
    %72 = arith.cmpi eq, %70, %71 : vector<24x1xi32>
    %73 = vector.extract_strided_slice %54 {offsets = [23, 0], sizes = [1, 1], strides = [1, 1]} : vector<24x1xf32> to vector<1x1xf32>
    %74 = vector.extract_strided_slice %54 {offsets = [0, 0], sizes = [23, 1], strides = [1, 1]} : vector<24x1xf32> to vector<23x1xf32>
    %75 = tpu.concatenate %73, %74 in 0 : vector<1x1xf32>, vector<23x1xf32> -> vector<24x1xf32>
    %76 = arith.select %72, %75, %54 : vector<24x1xi1>, vector<24x1xf32>
    %c2_i32_23 = arith.constant 2 : i32
    %77 = vector.broadcast %c2_i32_23 : i32 to vector<24x1xi32>
    %78 = arith.cmpi eq, %70, %77 : vector<24x1xi32>
    %79 = vector.extract_strided_slice %54 {offsets = [22, 0], sizes = [2, 1], strides = [1, 1]} : vector<24x1xf32> to vector<2x1xf32>
    %80 = vector.extract_strided_slice %54 {offsets = [0, 0], sizes = [22, 1], strides = [1, 1]} : vector<24x1xf32> to vector<22x1xf32>
    %81 = tpu.concatenate %79, %80 in 0 : vector<2x1xf32>, vector<22x1xf32> -> vector<24x1xf32>
    %82 = arith.select %78, %81, %76 : vector<24x1xi1>, vector<24x1xf32>
    %cst_24 = arith.constant 0.333333343 : f32
    %83 = vector.broadcast %cst_24 : f32 to vector<24x1xf32>
    %84 = arith.mulf %82, %83 : vector<24x1xf32>
    %85 = vector.extract_strided_slice %22 {offsets = [3, 0], sizes = [21, 1], strides = [1, 1]} : vector<24x1xf32> to vector<21x1xf32>
    %86 = vector.extract_strided_slice %22 {offsets = [0, 0], sizes = [3, 1], strides = [1, 1]} : vector<24x1xf32> to vector<3x1xf32>
    %87 = tpu.concatenate %85, %86 in 0 : vector<21x1xf32>, vector<3x1xf32> -> vector<24x1xf32>
    %88 = arith.addf %54, %87 : vector<24x1xf32>
    %c4_i32 = arith.constant 4 : i32
    %c0_i32_25 = arith.constant 0 : i32
    %89 = arith.cmpi eq, %c4_i32, %c0_i32_25 : i32
    %c1_i32_26 = arith.constant 1 : i32
    %90 = arith.select %89, %c1_i32_26, %c4_i32 : i32
    %91 = vector.broadcast %90 : i32 to vector<24x1xi32>
    %92 = arith.remsi %0, %91 : vector<24x1xi32>
    %c0_i32_27 = arith.constant 0 : i32
    %93 = vector.broadcast %c0_i32_27 : i32 to vector<24x1xi32>
    %94 = arith.cmpi ne, %92, %93 : vector<24x1xi32>
    %c0_i32_28 = arith.constant 0 : i32
    %95 = vector.broadcast %c0_i32_28 : i32 to vector<24x1xi32>
    %96 = arith.cmpi slt, %92, %95 : vector<24x1xi32>
    %c0_i32_29 = arith.constant 0 : i32
    %97 = arith.cmpi slt, %90, %c0_i32_29 : i32
    %98 = vector.broadcast %97 : i1 to vector<24x1xi1>
    %99 = vector.broadcast %98 : vector<24x1xi1> to vector<24x1xi1>
    %100 = arith.xori %96, %99 : vector<24x1xi1>
    %101 = arith.andi %100, %94 : vector<24x1xi1>
    %102 = vector.broadcast %90 : i32 to vector<24x1xi32>
    %103 = arith.addi %92, %102 : vector<24x1xi32>
    %104 = arith.select %101, %103, %92 : vector<24x1xi1>, vector<24x1xi32>
    %c1_i32_30 = arith.constant 1 : i32
    %105 = vector.broadcast %c1_i32_30 : i32 to vector<24x1xi32>
    %106 = arith.cmpi eq, %104, %105 : vector<24x1xi32>
    %107 = vector.extract_strided_slice %88 {offsets = [23, 0], sizes = [1, 1], strides = [1, 1]} : vector<24x1xf32> to vector<1x1xf32>
    %108 = vector.extract_strided_slice %88 {offsets = [0, 0], sizes = [23, 1], strides = [1, 1]} : vector<24x1xf32> to vector<23x1xf32>
    %109 = tpu.concatenate %107, %108 in 0 : vector<1x1xf32>, vector<23x1xf32> -> vector<24x1xf32>
    %110 = arith.select %106, %109, %88 : vector<24x1xi1>, vector<24x1xf32>
    %c2_i32_31 = arith.constant 2 : i32
    %111 = vector.broadcast %c2_i32_31 : i32 to vector<24x1xi32>
    %112 = arith.cmpi eq, %104, %111 : vector<24x1xi32>
    %113 = vector.extract_strided_slice %88 {offsets = [22, 0], sizes = [2, 1], strides = [1, 1]} : vector<24x1xf32> to vector<2x1xf32>
    %114 = vector.extract_strided_slice %88 {offsets = [0, 0], sizes = [22, 1], strides = [1, 1]} : vector<24x1xf32> to vector<22x1xf32>
    %115 = tpu.concatenate %113, %114 in 0 : vector<2x1xf32>, vector<22x1xf32> -> vector<24x1xf32>
    %116 = arith.select %112, %115, %110 : vector<24x1xi1>, vector<24x1xf32>
    %c3_i32_32 = arith.constant 3 : i32
    %117 = vector.broadcast %c3_i32_32 : i32 to vector<24x1xi32>
    %118 = arith.cmpi eq, %104, %117 : vector<24x1xi32>
    %119 = vector.extract_strided_slice %88 {offsets = [21, 0], sizes = [3, 1], strides = [1, 1]} : vector<24x1xf32> to vector<3x1xf32>
    %120 = vector.extract_strided_slice %88 {offsets = [0, 0], sizes = [21, 1], strides = [1, 1]} : vector<24x1xf32> to vector<21x1xf32>
    %121 = tpu.concatenate %119, %120 in 0 : vector<3x1xf32>, vector<21x1xf32> -> vector<24x1xf32>
    %122 = arith.select %118, %121, %116 : vector<24x1xi1>, vector<24x1xf32>
    %cst_33 = arith.constant 2.500000e-01 : f32
    %123 = vector.broadcast %cst_33 : f32 to vector<24x1xf32>
    %124 = arith.mulf %122, %123 : vector<24x1xf32>
    %125 = tpu.concatenate %22, %50, %84, %124 in 1 : vector<24x1xf32>, vector<24x1xf32>, vector<24x1xf32>, vector<24x1xf32> -> vector<24x4xf32>
    %cst_34 = arith.constant dense<0xFF800000> : vector<24xf32>
    %126 = vector.multi_reduction <maximumf>, %125, %cst_34 [1] : vector<24x4xf32> to vector<24xf32>
    %127 = vector.shape_cast %126 : vector<24xf32> to vector<24x1xf32>
    %128 = vector.broadcast %127 : vector<24x1xf32> to vector<24x4xf32>
    %129 = arith.subf %125, %128 : vector<24x4xf32>
    %130 = math.exp %129 : vector<24x4xf32>
    %cst_35 = arith.constant dense<0.000000e+00> : vector<24xf32>
    %131 = vector.multi_reduction <add>, %130, %cst_35 [1] : vector<24x4xf32> to vector<24xf32>
    %132 = vector.shape_cast %131 : vector<24xf32> to vector<24x1xf32>
    %133 = vector.broadcast %132 : vector<24x1xf32> to vector<24x4xf32>
    %134 = arith.divf %130, %133 : vector<24x4xf32>
    %c0_36 = arith.constant 0 : index
    %c0_37 = arith.constant 0 : index
    %135 = vector.load %arg9[%c0_36, %c0_37] : memref<24x4xf32, #tpu.memory_space<vmem>>, vector<24x4xf32>
    tpu.vector_store %arg9[%c0_36, %c0_37], %134 {strides = array<i32>} : memref<24x4xf32, #tpu.memory_space<vmem>>, vector<24x4xf32>,
    %136 = arith.truncf %134 : vector<24x4xf32> to vector<24x4xbf16>
    %c0_38 = arith.constant 0 : index
    %c0_39 = arith.constant 0 : index
    %137 = vector.load %arg9[%c0_38, %c0_39] : memref<24x4xf32, #tpu.memory_space<vmem>>, vector<24x4xf32>
    %138 = arith.truncf %137 : vector<24x4xf32> to vector<24x4xbf16>
    %cst_40 = arith.constant dense<0.000000e+00> : vector<24x24xf32>
    %139 = tpu.matmul %138, %136, %cst_40 {dimension_numbers = #tpu.dot_dimension_numbers<[1], [1], [0], [0], [0, 0, 1, 0], [], []>} : vector<24x4xbf16>, vector<24x4xbf16>, vector<24x24xf32> -> vector<24x24xf32>
    %cst_41 = arith.constant dense<0xFF800000> : vector<24xf32>
    %140 = vector.multi_reduction <maximumf>, %139, %cst_41 [1] : vector<24x24xf32> to vector<24xf32>
    %141 = vector.shape_cast %140 : vector<24xf32> to vector<24x1xf32>
    %142 = vector.broadcast %141 : vector<24x1xf32> to vector<24x24xf32>
    %143 = arith.subf %139, %142 : vector<24x24xf32>
    %144 = math.exp %143 : vector<24x24xf32>
    %cst_42 = arith.constant dense<0.000000e+00> : vector<24xf32>
    %145 = vector.multi_reduction <add>, %144, %cst_42 [1] : vector<24x24xf32> to vector<24xf32>
    %146 = vector.shape_cast %145 : vector<24xf32> to vector<24x1xf32>
    %147 = vector.broadcast %146 : vector<24x1xf32> to vector<24x24xf32>
    %148 = arith.divf %144, %147 : vector<24x24xf32>
    %149 = arith.truncf %148 : vector<24x24xf32> to vector<24x24xbf16>
    %cst_43 = arith.constant dense<0.000000e+00> : vector<24x4xf32>
    %150 = tpu.matmul %149, %136, %cst_43 {dimension_numbers = #tpu.dot_dimension_numbers<[1], [0], [0], [1], [0, 0, 1, 1], [], []>} : vector<24x24xbf16>, vector<24x4xbf16>, vector<24x4xf32> -> vector<24x4xf32>
    %c0_44 = arith.constant 0 : index
    %c0_45 = arith.constant 0 : index
    %151 = vector.load %arg10[%c0_44, %c0_45] : memref<24x4xf32, #tpu.memory_space<vmem>>, vector<24x4xf32>
    tpu.vector_store %arg10[%c0_44, %c0_45], %150 {strides = array<i32>} : memref<24x4xf32, #tpu.memory_space<vmem>>, vector<24x4xf32>,
    %c0_46 = arith.constant 0 : index
    %c0_47 = arith.constant 0 : index
    %152 = vector.load %arg10[%c0_46, %c0_47] : memref<24x4xf32, #tpu.memory_space<vmem>>, vector<24x4xf32>
    %153 = vector.extract_strided_slice %152 {offsets = [0, 0], sizes = [24, 1], strides = [1, 1]} : vector<24x4xf32> to vector<24x1xf32>
    %154 = vector.broadcast %153 : vector<24x1xf32> to vector<24x32xf32>
    %155 = arith.mulf %13, %154 : vector<24x32xf32>
    %156 = vector.extract_strided_slice %13 {offsets = [1, 0], sizes = [23, 32], strides = [1, 1]} : vector<24x32xf32> to vector<23x32xf32>
    %157 = vector.extract_strided_slice %13 {offsets = [0, 0], sizes = [1, 32], strides = [1, 1]} : vector<24x32xf32> to vector<1x32xf32>
    %158 = tpu.concatenate %156, %157 in 0 : vector<23x32xf32>, vector<1x32xf32> -> vector<24x32xf32>
    %159 = arith.addf %13, %158 : vector<24x32xf32>
    %c2_i32_48 = arith.constant 2 : i32
    %c0_i32_49 = arith.constant 0 : i32
    %160 = arith.cmpi eq, %c2_i32_48, %c0_i32_49 : i32
    %c1_i32_50 = arith.constant 1 : i32
    %161 = arith.select %160, %c1_i32_50, %c2_i32_48 : i32
    %162 = vector.broadcast %161 : i32 to vector<24x1xi32>
    %163 = arith.remsi %0, %162 : vector<24x1xi32>
    %c0_i32_51 = arith.constant 0 : i32
    %164 = vector.broadcast %c0_i32_51 : i32 to vector<24x1xi32>
    %165 = arith.cmpi ne, %163, %164 : vector<24x1xi32>
    %c0_i32_52 = arith.constant 0 : i32
    %166 = vector.broadcast %c0_i32_52 : i32 to vector<24x1xi32>
    %167 = arith.cmpi slt, %163, %166 : vector<24x1xi32>
    %c0_i32_53 = arith.constant 0 : i32
    %168 = arith.cmpi slt, %161, %c0_i32_53 : i32
    %169 = vector.broadcast %168 : i1 to vector<24x1xi1>
    %170 = vector.broadcast %169 : vector<24x1xi1> to vector<24x1xi1>
    %171 = arith.xori %167, %170 : vector<24x1xi1>
    %172 = arith.andi %171, %165 : vector<24x1xi1>
    %173 = vector.broadcast %161 : i32 to vector<24x1xi32>
    %174 = arith.addi %163, %173 : vector<24x1xi32>
    %175 = arith.select %172, %174, %163 : vector<24x1xi1>, vector<24x1xi32>
    %c1_i32_54 = arith.constant 1 : i32
    %176 = vector.broadcast %c1_i32_54 : i32 to vector<24x1xi32>
    %177 = arith.cmpi eq, %175, %176 : vector<24x1xi32>
    %178 = vector.extract_strided_slice %159 {offsets = [23, 0], sizes = [1, 32], strides = [1, 1]} : vector<24x32xf32> to vector<1x32xf32>
    %179 = vector.extract_strided_slice %159 {offsets = [0, 0], sizes = [23, 32], strides = [1, 1]} : vector<24x32xf32> to vector<23x32xf32>
    %180 = tpu.concatenate %178, %179 in 0 : vector<1x32xf32>, vector<23x32xf32> -> vector<24x32xf32>
    %181 = vector.shape_cast %177 : vector<24x1xi1> to vector<24x1xi1>
    %182 = vector.broadcast %181 : vector<24x1xi1> to vector<24x32xi1>
    %183 = arith.select %182, %180, %159 : vector<24x32xi1>, vector<24x32xf32>
    %cst_55 = arith.constant 5.000000e-01 : f32
    %184 = vector.broadcast %cst_55 : f32 to vector<24x32xf32>
    %185 = arith.mulf %183, %184 : vector<24x32xf32>
    %186 = vector.extract_strided_slice %152 {offsets = [0, 1], sizes = [24, 1], strides = [1, 1]} : vector<24x4xf32> to vector<24x1xf32>
    %187 = vector.broadcast %186 : vector<24x1xf32> to vector<24x32xf32>
    %188 = arith.mulf %185, %187 : vector<24x32xf32>
    %189 = arith.addf %155, %188 : vector<24x32xf32>
    %190 = vector.extract_strided_slice %13 {offsets = [2, 0], sizes = [22, 32], strides = [1, 1]} : vector<24x32xf32> to vector<22x32xf32>
    %191 = vector.extract_strided_slice %13 {offsets = [0, 0], sizes = [2, 32], strides = [1, 1]} : vector<24x32xf32> to vector<2x32xf32>
    %192 = tpu.concatenate %190, %191 in 0 : vector<22x32xf32>, vector<2x32xf32> -> vector<24x32xf32>
    %193 = arith.addf %159, %192 : vector<24x32xf32>
    %c3_i32_56 = arith.constant 3 : i32
    %c0_i32_57 = arith.constant 0 : i32
    %194 = arith.cmpi eq, %c3_i32_56, %c0_i32_57 : i32
    %c1_i32_58 = arith.constant 1 : i32
    %195 = arith.select %194, %c1_i32_58, %c3_i32_56 : i32
    %196 = vector.broadcast %195 : i32 to vector<24x1xi32>
    %197 = arith.remsi %0, %196 : vector<24x1xi32>
    %c0_i32_59 = arith.constant 0 : i32
    %198 = vector.broadcast %c0_i32_59 : i32 to vector<24x1xi32>
    %199 = arith.cmpi ne, %197, %198 : vector<24x1xi32>
    %c0_i32_60 = arith.constant 0 : i32
    %200 = vector.broadcast %c0_i32_60 : i32 to vector<24x1xi32>
    %201 = arith.cmpi slt, %197, %200 : vector<24x1xi32>
    %c0_i32_61 = arith.constant 0 : i32
    %202 = arith.cmpi slt, %195, %c0_i32_61 : i32
    %203 = vector.broadcast %202 : i1 to vector<24x1xi1>
    %204 = vector.broadcast %203 : vector<24x1xi1> to vector<24x1xi1>
    %205 = arith.xori %201, %204 : vector<24x1xi1>
    %206 = arith.andi %205, %199 : vector<24x1xi1>
    %207 = vector.broadcast %195 : i32 to vector<24x1xi32>
    %208 = arith.addi %197, %207 : vector<24x1xi32>
    %209 = arith.select %206, %208, %197 : vector<24x1xi1>, vector<24x1xi32>
    %c1_i32_62 = arith.constant 1 : i32
    %210 = vector.broadcast %c1_i32_62 : i32 to vector<24x1xi32>
    %211 = arith.cmpi eq, %209, %210 : vector<24x1xi32>
    %212 = vector.extract_strided_slice %193 {offsets = [23, 0], sizes = [1, 32], strides = [1, 1]} : vector<24x32xf32> to vector<1x32xf32>
    %213 = vector.extract_strided_slice %193 {offsets = [0, 0], sizes = [23, 32], strides = [1, 1]} : vector<24x32xf32> to vector<23x32xf32>
    %214 = tpu.concatenate %212, %213 in 0 : vector<1x32xf32>, vector<23x32xf32> -> vector<24x32xf32>
    %215 = vector.shape_cast %211 : vector<24x1xi1> to vector<24x1xi1>
    %216 = vector.broadcast %215 : vector<24x1xi1> to vector<24x32xi1>
    %217 = arith.select %216, %214, %193 : vector<24x32xi1>, vector<24x32xf32>
    %c2_i32_63 = arith.constant 2 : i32
    %218 = vector.broadcast %c2_i32_63 : i32 to vector<24x1xi32>
    %219 = arith.cmpi eq, %209, %218 : vector<24x1xi32>
    %220 = vector.extract_strided_slice %193 {offsets = [22, 0], sizes = [2, 32], strides = [1, 1]} : vector<24x32xf32> to vector<2x32xf32>
    %221 = vector.extract_strided_slice %193 {offsets = [0, 0], sizes = [22, 32], strides = [1, 1]} : vector<24x32xf32> to vector<22x32xf32>
    %222 = tpu.concatenate %220, %221 in 0 : vector<2x32xf32>, vector<22x32xf32> -> vector<24x32xf32>
    %223 = vector.shape_cast %219 : vector<24x1xi1> to vector<24x1xi1>
    %224 = vector.broadcast %223 : vector<24x1xi1> to vector<24x32xi1>
    %225 = arith.select %224, %222, %217 : vector<24x32xi1>, vector<24x32xf32>
    %cst_64 = arith.constant 0.333333343 : f32
    %226 = vector.broadcast %cst_64 : f32 to vector<24x32xf32>
    %227 = arith.mulf %225, %226 : vector<24x32xf32>
    %228 = vector.extract_strided_slice %152 {offsets = [0, 2], sizes = [24, 1], strides = [1, 1]} : vector<24x4xf32> to vector<24x1xf32>
    %229 = vector.broadcast %228 : vector<24x1xf32> to vector<24x32xf32>
    %230 = arith.mulf %227, %229 : vector<24x32xf32>
    %231 = arith.addf %189, %230 : vector<24x32xf32>
    %232 = vector.extract_strided_slice %13 {offsets = [3, 0], sizes = [21, 32], strides = [1, 1]} : vector<24x32xf32> to vector<21x32xf32>
    %233 = vector.extract_strided_slice %13 {offsets = [0, 0], sizes = [3, 32], strides = [1, 1]} : vector<24x32xf32> to vector<3x32xf32>
    %234 = tpu.concatenate %232, %233 in 0 : vector<21x32xf32>, vector<3x32xf32> -> vector<24x32xf32>
    %235 = arith.addf %193, %234 : vector<24x32xf32>
    %c4_i32_65 = arith.constant 4 : i32
    %c0_i32_66 = arith.constant 0 : i32
    %236 = arith.cmpi eq, %c4_i32_65, %c0_i32_66 : i32
    %c1_i32_67 = arith.constant 1 : i32
    %237 = arith.select %236, %c1_i32_67, %c4_i32_65 : i32
    %238 = vector.broadcast %237 : i32 to vector<24x1xi32>
    %239 = arith.remsi %0, %238 : vector<24x1xi32>
    %c0_i32_68 = arith.constant 0 : i32
    %240 = vector.broadcast %c0_i32_68 : i32 to vector<24x1xi32>
    %241 = arith.cmpi ne, %239, %240 : vector<24x1xi32>
    %c0_i32_69 = arith.constant 0 : i32
    %242 = vector.broadcast %c0_i32_69 : i32 to vector<24x1xi32>
    %243 = arith.cmpi slt, %239, %242 : vector<24x1xi32>
    %c0_i32_70 = arith.constant 0 : i32
    %244 = arith.cmpi slt, %237, %c0_i32_70 : i32
    %245 = vector.broadcast %244 : i1 to vector<24x1xi1>
    %246 = vector.broadcast %245 : vector<24x1xi1> to vector<24x1xi1>
    %247 = arith.xori %243, %246 : vector<24x1xi1>
    %248 = arith.andi %247, %241 : vector<24x1xi1>
    %249 = vector.broadcast %237 : i32 to vector<24x1xi32>
    %250 = arith.addi %239, %249 : vector<24x1xi32>
    %251 = arith.select %248, %250, %239 : vector<24x1xi1>, vector<24x1xi32>
    %c1_i32_71 = arith.constant 1 : i32
    %252 = vector.broadcast %c1_i32_71 : i32 to vector<24x1xi32>
    %253 = arith.cmpi eq, %251, %252 : vector<24x1xi32>
    %254 = vector.extract_strided_slice %235 {offsets = [23, 0], sizes = [1, 32], strides = [1, 1]} : vector<24x32xf32> to vector<1x32xf32>
    %255 = vector.extract_strided_slice %235 {offsets = [0, 0], sizes = [23, 32], strides = [1, 1]} : vector<24x32xf32> to vector<23x32xf32>
    %256 = tpu.concatenate %254, %255 in 0 : vector<1x32xf32>, vector<23x32xf32> -> vector<24x32xf32>
    %257 = vector.shape_cast %253 : vector<24x1xi1> to vector<24x1xi1>
    %258 = vector.broadcast %257 : vector<24x1xi1> to vector<24x32xi1>
    %259 = arith.select %258, %256, %235 : vector<24x32xi1>, vector<24x32xf32>
    %c2_i32_72 = arith.constant 2 : i32
    %260 = vector.broadcast %c2_i32_72 : i32 to vector<24x1xi32>
    %261 = arith.cmpi eq, %251, %260 : vector<24x1xi32>
    %262 = vector.extract_strided_slice %235 {offsets = [22, 0], sizes = [2, 32], strides = [1, 1]} : vector<24x32xf32> to vector<2x32xf32>
    %263 = vector.extract_strided_slice %235 {offsets = [0, 0], sizes = [22, 32], strides = [1, 1]} : vector<24x32xf32> to vector<22x32xf32>
    %264 = tpu.concatenate %262, %263 in 0 : vector<2x32xf32>, vector<22x32xf32> -> vector<24x32xf32>
    %265 = vector.shape_cast %261 : vector<24x1xi1> to vector<24x1xi1>
    %266 = vector.broadcast %265 : vector<24x1xi1> to vector<24x32xi1>
    %267 = arith.select %266, %264, %259 : vector<24x32xi1>, vector<24x32xf32>
    %c3_i32_73 = arith.constant 3 : i32
    %268 = vector.broadcast %c3_i32_73 : i32 to vector<24x1xi32>
    %269 = arith.cmpi eq, %251, %268 : vector<24x1xi32>
    %270 = vector.extract_strided_slice %235 {offsets = [21, 0], sizes = [3, 32], strides = [1, 1]} : vector<24x32xf32> to vector<3x32xf32>
    %271 = vector.extract_strided_slice %235 {offsets = [0, 0], sizes = [21, 32], strides = [1, 1]} : vector<24x32xf32> to vector<21x32xf32>
    %272 = tpu.concatenate %270, %271 in 0 : vector<3x32xf32>, vector<21x32xf32> -> vector<24x32xf32>
    %273 = vector.shape_cast %269 : vector<24x1xi1> to vector<24x1xi1>
    %274 = vector.broadcast %273 : vector<24x1xi1> to vector<24x32xi1>
    %275 = arith.select %274, %272, %267 : vector<24x32xi1>, vector<24x32xf32>
    %cst_74 = arith.constant 2.500000e-01 : f32
    %276 = vector.broadcast %cst_74 : f32 to vector<24x32xf32>
    %277 = arith.mulf %275, %276 : vector<24x32xf32>
    %278 = vector.extract_strided_slice %152 {offsets = [0, 3], sizes = [24, 1], strides = [1, 1]} : vector<24x4xf32> to vector<24x1xf32>
    %279 = vector.broadcast %278 : vector<24x1xf32> to vector<24x32xf32>
    %280 = arith.mulf %277, %279 : vector<24x32xf32>
    %281 = arith.addf %231, %280 : vector<24x32xf32>
    %c0_75 = arith.constant 0 : index
    %c0_76 = arith.constant 0 : index
    %282 = vector.load %arg8[%c0_75, %c0_76] : memref<24x32xf32, #tpu.memory_space<vmem>>, vector<24x32xf32>
    tpu.vector_store %arg8[%c0_75, %c0_76], %281 {strides = array<i32>} : memref<24x32xf32, #tpu.memory_space<vmem>>, vector<24x32xf32>,
    %c0_77 = arith.constant 0 : index
    %c0_78 = arith.constant 0 : index
    %c0_79 = arith.constant 0 : index
    %283 = vector.load %arg6[%c0_77, %c0_78, %c0_79] : memref<1x24x32xf32, #tpu.memory_space<vmem>>, vector<1x24x32xf32>
    %284 = vector.shape_cast %283 : vector<1x24x32xf32> to vector<24x32xf32>
    %285 = vector.shape_cast %281 : vector<24x32xf32> to vector<1x24x32xf32>
    tpu.vector_store %arg6[%c0_77, %c0_78, %c0_79], %285 {strides = array<i32>} : memref<1x24x32xf32, #tpu.memory_space<vmem>>, vector<1x24x32xf32>,
    %c0_80 = arith.constant 0 : index
    %c0_81 = arith.constant 0 : index
    %286 = tpu.strided_load %arg8[%c0_80, %c0_81] {strides = array<i32: 4, 1>} : memref<24x32xf32, #tpu.memory_space<vmem>>, vector<4x32xf32>
    %c1 = arith.constant 1 : index
    %c0_82 = arith.constant 0 : index
    %287 = tpu.strided_load %arg8[%c1, %c0_82] {strides = array<i32: 4, 1>} : memref<24x32xf32, #tpu.memory_space<vmem>>, vector<4x32xf32>
    %288 = arith.addf %286, %287 : vector<4x32xf32>
    %c2 = arith.constant 2 : index
    %c0_83 = arith.constant 0 : index
    %289 = tpu.strided_load %arg8[%c2, %c0_83] {strides = array<i32: 4, 1>} : memref<24x32xf32, #tpu.memory_space<vmem>>, vector<4x32xf32>
    %290 = arith.addf %288, %289 : vector<4x32xf32>
    %c3 = arith.constant 3 : index
    %c0_84 = arith.constant 0 : index
    %291 = tpu.strided_load %arg8[%c3, %c0_84] {strides = array<i32: 4, 1>} : memref<24x32xf32, #tpu.memory_space<vmem>>, vector<4x32xf32>
    %292 = arith.addf %290, %291 : vector<4x32xf32>
    %cst_85 = arith.constant 2.500000e-01 : f32
    %293 = vector.broadcast %cst_85 : f32 to vector<4x32xf32>
    %294 = arith.mulf %292, %293 : vector<4x32xf32>
    %c0_86 = arith.constant 0 : index
    %c0_87 = arith.constant 0 : index
    %c0_88 = arith.constant 0 : index
    %295 = vector.load %arg7[%c0_86, %c0_87, %c0_88] : memref<1x4x32xf32, #tpu.memory_space<vmem>>, vector<1x4x32xf32>
    %296 = vector.shape_cast %295 : vector<1x4x32xf32> to vector<4x32xf32>
    %297 = vector.shape_cast %294 : vector<4x32xf32> to vector<1x4x32xf32>
    tpu.vector_store %arg7[%c0_86, %c0_87, %c0_88], %297 {strides = array<i32>} : memref<1x4x32xf32, #tpu.memory_space<vmem>>, vector<1x4x32xf32>,
    return
  }
  func.func @transform_0(%arg0: i32) -> (i32, i32, i32) {
    %c0_i32 = arith.constant 0 : i32
    %c0_i32_0 = arith.constant 0 : i32
    %c0_i32_1 = arith.constant 0 : i32
    return %arg0, %c0_i32, %c0_i32_0 : i32, i32, i32
  }
  func.func @transform_1(%arg0: i32) -> (i32, i32) {
    %c0_i32 = arith.constant 0 : i32
    %c0_i32_0 = arith.constant 0 : i32
    %c0_i32_1 = arith.constant 0 : i32
    return %c0_i32, %c0_i32_0 : i32, i32
  }
  func.func @transform_2(%arg0: i32) -> (i32, i32) {
    %c0_i32 = arith.constant 0 : i32
    %c0_i32_0 = arith.constant 0 : i32
    %c0_i32_1 = arith.constant 0 : i32
    return %c0_i32, %c0_i32_0 : i32, i32
  }
  func.func @transform_3(%arg0: i32) -> (i32, i32) {
    %c0_i32 = arith.constant 0 : i32
    %c0_i32_0 = arith.constant 0 : i32
    %c0_i32_1 = arith.constant 0 : i32
    return %c0_i32, %c0_i32_0 : i32, i32
  }
  func.func @transform_4(%arg0: i32) -> (i32, i32) {
    %c0_i32 = arith.constant 0 : i32
    %c0_i32_0 = arith.constant 0 : i32
    %c0_i32_1 = arith.constant 0 : i32
    return %c0_i32, %c0_i32_0 : i32, i32
  }
  func.func @transform_5(%arg0: i32) -> (i32, i32, i32) {
    %c0_i32 = arith.constant 0 : i32
    %c0_i32_0 = arith.constant 0 : i32
    %c0_i32_1 = arith.constant 0 : i32
    return %arg0, %c0_i32, %c0_i32_0 : i32, i32, i32
  }
  func.func @transform_6(%arg0: i32) -> (i32, i32, i32) {
    %c0_i32 = arith.constant 0 : i32
    %c0_i32_0 = arith.constant 0 : i32
    %c0_i32_1 = arith.constant 0 : i32
    return %arg0, %c0_i32, %c0_i32_0 : i32, i32, i32
  }
}

</mosaic_0001>

<bundles_post_ra>
// kernel: tpu_custom_call.1
= control target key start
LH: loop header
LB: loop body
LE: loop exit
PB: predicated region body
PF: predicated region fallthrough
CT: control target
= control target key end

     0   :  { %s2190_s0 = inlined_call_operand.vmem [shape: bf16[2,24,16], index: 0, kind: input, shape index: {}]   ;;  %s2191_s1 = inlined_call_operand.vmem [shape: bf16[16,32], index: 1, kind: input, shape index: {}]   ;;  %s2192_s2 = inlined_call_operand.vmem [shape: f32[1,32], index: 2, kind: input, shape index: {}]   ;;  %s2193_s3 = inlined_call_operand.vmem [shape: f32[1,32], index: 3, kind: input, shape index: {}]   ;;  %s2194_s4 = inlined_call_operand.<no memory space> [shape: f32[1,1], index: 4, kind: input, shape index: {}]   ;;  %s2195_s5 = inlined_call_operand.hbm [shape: f32[2,24,32], index: 5, kind: output, shape index: {0}]   ;;  %s2196_s6 = inlined_call_operand.hbm [shape: f32[2,4,32], index: 6, kind: output, shape index: {1}]  }
   0x1   :  { %v12_v0 = vstv %s2194_s4 }
   0x2   :  { %13 = vst [vmem:[#allocation5] sm:$0x1] %v12_v0 }
   0x3   :  { %14 = vsyncpa [#allocation7], 0 }
   0x4   :  { %16 = vsyncpa [#allocation7 + $0x1], 0 }
   0x5   :  { %17 = vsyncpa [#allocation9], 0 }
   0x6   :  { %19 = vsyncpa [#allocation9 + $0x1], 0  ;;  %s1621_s23 = smov 0   ;;  %s1623_s24 = smov 0  }
   0x7   :  { %s1625_s25 = smov 0   ;;  %s1627_s26 = smov 0  }
   0x8 LB: > { %s1642_s4 = sadd.s32 4294967295, %s1571_s26   ;;  %s1351_s27 = sadd.s32 4294967294, %s1571_s26   ;;  %s1571_s26 = sphi %s1627_s26, %s2261_s26   ;;  %s1567_s25 = sphi %s1625_s25, %s2260_s25   ;;  %s1563_s24 = sphi %s1623_s24, %s2259_s24   ;;  %s1559_s23 = sphi %s1621_s23, %s2258_s23  }
   0x9   : > { %s1646_s28 = sadd.s32 1, %s1571_s26   ;;  %s142_s29 = sadd.s32 1, %s1567_s25 }
   0xa   : > { %s139_s30 = ssub.s32 %s1571_s26, %s1646_s28  ;;  %p152_p0 = scmp.ne.s32.totalorder %s1567_s25, %s1563_s24 }
   0xb   : > { %p140_p1 = scmp.eq.s32.totalorder %s139_s30, 0  ;;  %p153_p2 = scmp.eq.s32.totalorder %s1642_s4, 1 }
   0xc   : > { %p158_p3 = scmp.ne.s32.totalorder %s1563_s24, %s1559_s23  ;;  %p159_p4 = scmp.eq.s32.totalorder %s1351_s27, 1 }
   0xd   : > { %s1657_s7 = scalar_select %p140_p1, %s1567_s25, %s142_s29  }
   0xe   : > { %p1659_p5 = por %p153_p2, %p152_p0  ;;  %p1663_p6 = por %p159_p4, %p158_p3 }
   0xf   : > { %p1354_p7 = scmp.ge.s32.totalorder %s1571_s26, 1  ;;  %p223_p8 = scmp.lt.s32.totalorder %s1571_s26, 3 }
  0x11   : > { %p224_p9 = pnand %p1354_p7, %p223_p8 }
  0x12   : > { %p258_p10 = scmp.lt.s32.totalorder (!%p224_p9), %s1642_s4, 1  ;;  %s1574_s22 = smov (!%p224_p9), 1  }
  0x13   : > { %227 = sbr.rel (%p224_p9) target bundleno = 1407 (0x57f), region = 40  ;;  %s1575_s27 = smov (!%p224_p9), 3  }
  0x14   : > { %s1576_s29 = smov (!%p224_p9), 2   ;;  %s2077_s30 = sand.u32 (!%p224_p9), 1, %s1563_s24  }
  0x15   : > { %s1380_s10 = smul.u32 (!%p224_p9), 24, %s2077_s30 }
  0x16   : > { %s1384_s14 = smul.u32 (!%p224_p9), 24, %s1642_s4 }
  0x17   : > { %s2092_s11 = scalar_lea.vmem (!%p224_p9), [#allocation6], %s1380_s10  ;;  %s1227_s10 = scalar_lea.sflag (!%p224_p9), [#allocation9], %s2077_s30 }
  0x18   : > { %v1377_v1 = vld [vmem:[%s2191_s1] sm:$0xff]  ;;  %s259_s12 = scalar_select %p258_p10, %s1642_s4, 1  ;;  %vm2199_vm0 = vcmask 130048   ;;  %vm2197_vm1 = vcmask 261120   ;;  %v1573_v6 = vmov 0   ;;  %v264_v17 = vlaneseq }
  0x19   : > { %305 = vmatpush.bf16.msra.mxu0 %v1377_v1  ;;  %v1452_v3 = vld [vmem:[%s2193_s3] ss:$0 sm:$0xff]  ;;  %1439 = vset.pattern.permute.xlu2 %v1573_v6  ;;  %v345_v7 = vld [vmem:[#allocation5] sm:$0x1]  ;;  %vm2198_vm8 = vcmask 1046528   ;;  %vm2201_vm9 = vcmask 1045504   ;;  %s1238_s19 = scalar_lea.hbm %s2195_s5, %s1384_s14 }
  0x1a   : > { %s1381_s13 = smul.u32 12, %s259_s12  ;;  %v334_v4 = vmul.f32 0.0, %v1452_v3  ;;  %1382 = vpush %v345_v7  ;;  %v1451_v8 = vld [vmem:[%s2192_s2] ss:$0 sm:$0xff]  ;;  %v1697_v18 = vshrl.u32 %v264_v17, 7  ;;  %vm2200_vm12 = vcmask 1044480  }
  0x1b   : > { %vm412_vm15 = vcmask 1040384   ;;  %s1355_s12 = sshll.u32 %s2077_s30, 2 }
  0x1c   : > { %s1677_s16 = scalar_lea.vmem %s2190_s0, %s1381_s13  ;;  %v342_v5 = vsel %vm2197_vm1, %v334_v4, 0.0  ;;  %v1700_v19 = vadd.s32 16, %v1697_v18  ;;  %v444_v23 = vand.u32 65535, %v1697_v18  ;;  %v445_v27 = vshrl.u32 %v1697_v18, 16  ;;  %s1373_s13 = sshll.u32 %s1642_s4, 2 }
  0x1d   : > { %v1376_v2 = vld [vmem:[%s1677_s16] sm:$0xff]  ;;  %343 = vadd.xlane.f32.xlu1 %v342_v5  ;;  %v1708_v36 = vadd.s32 8, %v1697_v18  ;;  %s1254_s17 = scalar_lea.hbm %s2196_s6, %s1373_s13  ;;  %s257_s20 = scalar_lea.vmem [#allocation8], %s1355_s12 }
  0x1e   : > { %1365 = vmatmul.msk.bf16.vlgmr.msra.gmra.mxu0 %vm2199_vm0, %v1376_v2  ;;  %v502_v20 = vand.u32 65535, %v1700_v19  ;;  %v503_v21 = vshrl.u32 %v1700_v19, 16  ;;  %v448_v28 = vmul.u32 43690, %v444_v23  ;;  %v447_v33 = vmul.u32 43691, %v444_v23 }
  0x1f   : > { %v449_v34 = vmul.u32 43691, %v445_v27  ;;  %v473_v41 = vand.u32 65535, %v1708_v36  ;;  %v450_v42 = vmul.u32 43690, %v445_v27  ;;  %v474_v46 = vshrl.u32 %v1708_v36, 16 }
  0x20   : > { %v506_v22 = vmul.u32 43690, %v502_v20  ;;  %v505_v24 = vmul.u32 43691, %v502_v20  ;;  %v507_v25 = vmul.u32 43691, %v503_v21  ;;  %v508_v31 = vmul.u32 43690, %v503_v21 }
  0x21   : > { %v451_v35 = vshll.u32 %v448_v28, 16  ;;  %v453_v39 = vshll.u32 %v449_v34, 16  ;;  %v477_v47 = vmul.u32 43690, %v473_v41  ;;  %v476_v52 = vmul.u32 43691, %v473_v41 }
  0x22   : > { %v509_v26 = vshll.u32 %v506_v22, 16  ;;  %v511_v29 = vshll.u32 %v507_v25, 16  ;;  %v510_v43 = vshrl.u32 %v506_v22, 16  ;;  %v512_v49 = vshrl.u32 %v507_v25, 16 }
  0x23   : > { %vm455_vm4 = vc.u32 %v447_v33, %v451_v35  ;;  %v457_v40 = vadd.s32 %v451_v35, %v447_v33  ;;  %v478_v53 = vmul.u32 43691, %v474_v46  ;;  %v480_v54 = vshll.u32 %v477_v47, 16 }
  0x24   : > { %vm513_vm2 = vc.u32 %v505_v24, %v509_v26  ;;  %v515_v30 = vadd.s32 %v509_v26, %v505_v24  ;;  %v456_v45 = vsel %vm455_vm4, 1, %v1573_v6  ;;  %v452_v55 = vshrl.u32 %v448_v28, 16 }
  0x25   : > { %v514_v32 = vsel %vm513_vm2, 1, %v1573_v6  ;;  %vm459_vm5 = vc.u32 %v457_v40, %v453_v39  ;;  %v458_v48 = vadd.s32 %v456_v45, %v450_v42  ;;  %v482_v58 = vshll.u32 %v478_v53, 16 }
  0x26   : > { %vm517_vm3 = vc.u32 %v515_v30, %v511_v29  ;;  %v516_v37 = vadd.s32 %v514_v32, %v508_v31  ;;  %v460_v51 = vsel %vm459_vm5, 1, %v1573_v6  ;;  %vm484_vm6 = vc.u32 %v476_v52, %v480_v54 }
  0x27   : > { %v518_v38 = vsel %vm517_vm3, 1, %v1573_v6  ;;  %v462_v56 = vadd.s32 %v460_v51, %v458_v48  ;;  %v486_v59 = vadd.s32 %v480_v54, %v476_v52  ;;  %v454_v60 = vshrl.u32 %v449_v34, 16 }
  0x28   : > { %v520_v44 = vadd.s32 %v518_v38, %v516_v37  ;;  %v479_v63 = vmul.u32 43690, %v474_v46  ;;  %v485_v2 = vsel %vm484_vm6, 1, %v1573_v6  ;;  %v386_v23 = vand.u32 1, %v1700_v19 }
  0x29   : > { %v463_v61 = vadd.s32 %v462_v56, %v452_v55  ;;  %vm488_vm7 = vc.u32 %v486_v59, %v482_v58  ;;  %v483_v26 = vshrl.u32 %v478_v53, 16  ;;  %v372_v32 = vand.u32 1, %v1697_v18 }
  0x2a   : > { %v521_v50 = vadd.s32 %v520_v44, %v510_v43  ;;  %v487_v7 = vadd.s32 %v485_v2, %v479_v63  ;;  %v379_v35 = vand.u32 1, %v1708_v36  ;;  %vm1748_vm14 = vcmp.eq.s32.totalorder %v386_v23, 1 }
  0x2b   : > { %v1753_v43 = vand.u32 3, %v1697_v18  ;;  %vm1763_vm2 = vcmp.eq.s32.totalorder %v372_v32, 1  ;;  %vm567_vm6 = vcmask 1041408  }
  0x2c   : > { %v522_v57 = vadd.s32 %v521_v50, %v512_v49  ;;  %vm1767_vm3 = vcmp.eq.s32.totalorder %v379_v35, 1 }
  0x2d   : > { %vm2204_vm0 = vcmp.eq.s32.totalorder %v1753_v43, 3 }
  0x2e   : > { %v523_v62 = vshrl.u32 %v522_v57, 1 }
  0x30   : > { %v524_v5 = vmul.u32 3, %v523_v62 }
  0x4b   : > { %s1383_s21 = spop %1382 }
  0x4c   : > { %v347_v0 = vstv %s1383_s21  ;;  %s1256_s21 = sshll.u32 %s257_s20, 4  ;;  %s1257_s21 = int_to_ptr.vmem [resolvable:$true] %s1256_s21 }
  0x90   : > { %v344_v1 = vpop.xlane.xlu1 %343 }
  0x91   : > { %v1716_v4 = vadd.f32 %v347_v0, %v344_v1 }
  0x93   : > { %v431_v20 = vrot.slane %v1716_v4, 2  ;;  %v586_v28 = vrot.slane %v1716_v4, 3 }
  0x9b   : > { %v307_v9 = vpop.f32.mrf.mxu0 }
  0x9c   : > { %v1689_v10 = vadd.f32 %v1451_v8, %v307_v9 }
  0x9e   : > { %v332_v11 = vmul.f32 %v1452_v3, %v1689_v10 }
  0xa0   : > { %v336_v12 = vsel %vm2197_vm1, %v332_v11, 0.0 }
  0xa1   : > { %337 = vadd.xlane.f32.xlu0 %v336_v12  ;;  %v481_v12 = vshrl.u32 %v477_v47, 16  ;;  %v1761_v47 = vand.u32 3, %v1708_v36 }
  0xa3   : > { %v309_v13 = vpop.f32.mrf.mxu0  ;;  %vm2207_vm5 = vcmp.eq.s32.totalorder %v1761_v47, 3 }
  0xa4   : > { %v1693_v14 = vadd.f32 %v1451_v8, %v309_v13  ;;  %v489_v8 = vsel %vm488_vm7, 1, %v1573_v6  ;;  %v358_v13 = vrot.slane %v1716_v4, 1  ;;  %vm2212_vm7 = vcmp.eq.s32.totalorder %v1753_v43, 1 }
  0xa5   : > { %v491_v17 = vadd.s32 %v489_v8, %v487_v7 }
  0xa6   : > { %v333_v15 = vmul.f32 %v1452_v3, %v1693_v14  ;;  %v464_v3 = vadd.s32 %v463_v61, %v454_v60 }
  0xa7   : > { %v492_v27 = vadd.s32 %v491_v17, %v481_v12 }
  0xa8   : > { %v339_v16 = vsel %vm2197_vm1, %v333_v15, 0.0  ;;  %v465_v11 = vshrl.u32 %v464_v3, 1  ;;  %vm2215_vm1 = vcmp.eq.s32.totalorder %v1761_v47, 2 }
  0xa9   : > { %340 = vadd.xlane.f32.xlu0 %v339_v16  ;;  %v525_v16 = vsub.s32 %v1700_v19, %v524_v5  ;;  %v1745_v40 = vadd.s32 %v492_v27, %v483_v26 }
  0xaa   : > { %v466_v24 = vmul.u32 3, %v465_v11 }
  0xab   : > { %vm530_vm10 = vcmp.ne.s32.totalorder %v525_v16, 0  ;;  %vm533_vm11 = vcmp.lt.s32.totalorder %v525_v16, 0  ;;  %v539_v37 = vadd.s32 3, %v525_v16  ;;  %v494_v54 = vshrl.u32 %v1745_v40, 1 }
  0xac   : > { %v1740_v38 = vsub.s32 %v1697_v18, %v466_v24  ;;  %vm536_vm13 = vmand %vm533_vm11, %vm530_vm10  ;;  %vm2213_vm10 = vcmask 1042432   ;;  %vm633_vm11 = vcmp.eq.s32.totalorder %v1761_v47, 1  ;;  %v1891_v40 = vand.u32 3, %v1700_v19 }
  0xad   : > { %v1771_v18 = vsel %vm536_vm13, %v539_v37, %v525_v16  ;;  %vm2205_vm13 = vcmp.eq.s32.totalorder %v1753_v43, 2 }
  0xae   : > { %v1774_v50 = vadd.s32 3, %v1740_v38  ;;  %vm528_vm4 = vcmp.ne.s32.totalorder %v1740_v38, 0 }
 0x114   : > { %v338_v9 = vpop.xlane.xlu0 %337 }
 0x115   : > { %v1720_v15 = vadd.f32 %v347_v0, %v338_v9 }
 0x117   : > { %v355_v21 = vrot.slane %v1720_v15, 1  ;;  %v428_v22 = vrot.slane %v1720_v15, 2  ;;  %v583_v29 = vrot.slane %v1720_v15, 3 }
 0x119   : > { %v364_v25 = vsel %vm2198_vm8, %v358_v13, %v355_v21  ;;  %v437_v31 = vsel %vm2201_vm9, %v431_v20, %v428_v22  ;;  %v592_v41 = vsel %vm2200_vm12, %v586_v28, %v583_v29 }
 0x11a   : > { %v1731_v30 = vadd.f32 %v364_v25, %v1716_v4 }
 0x11c   : > { %v341_v33 = vpop.xlane.xlu0 %340  ;;  %v1736_v34 = vadd.f32 %v437_v31, %v1731_v30  ;;  %v408_v53 = vrot.slane %v1731_v30, 7 }
 0x11d   : > { %v1742_v39 = vadd.f32 %v347_v0, %v341_v33 }
 0x11e   : > { %v1758_v46 = vadd.f32 %v592_v41, %v1736_v34  ;;  %v547_v57 = vrot.slane %v1736_v34, 7  ;;  %v565_v58 = vrot.slane %v1736_v34, 6 }
 0x11f   : > { %v356_v44 = vrot.slane %v1742_v39, 1  ;;  %v429_v45 = vrot.slane %v1742_v39, 2  ;;  %v584_v52 = vrot.slane %v1742_v39, 3 }
 0x120   : > { %v636_v61 = vrot.slane %v1758_v46, 7  ;;  %v654_v62 = vrot.slane %v1758_v46, 6  ;;  %v670_v2 = vrot.slane %v1758_v46, 5 }
 0x121   : > { %v359_v51 = vsel %vm2198_vm8, %v356_v44, %v358_v13  ;;  %v357_v56 = vsel %vm2198_vm8, %v355_v21, %v356_v44  ;;  %v432_v59 = vsel %vm2201_vm9, %v429_v45, %v431_v20  ;;  %v430_v1 = vsel %vm2201_vm9, %v428_v22, %v429_v45 }
 0x122   : > { %v366_v55 = vadd.f32 %v359_v51, %v1742_v39  ;;  %v365_v60 = vadd.f32 %v357_v56, %v1720_v15  ;;  %vm2203_vm8 = vcmp.eq.s32.totalorder %v1771_v18, 1  ;;  %v585_v3 = vsel %vm2200_vm12, %v583_v29, %v584_v52 }
 0x123   : > { %v587_v5 = vsel %vm2200_vm12, %v584_v52, %v586_v28  ;;  %vm2225_vm12 = vcmp.lt.s32.totalorder %v1740_v38, 0 }
 0x124   : > { %v1792_v63 = vadd.f32 %v432_v59, %v366_v55  ;;  %v414_v0 = vrot.slane %v366_v55, 7  ;;  %v413_v7 = vrot.slane %v365_v60, 7  ;;  %v1801_v8 = vadd.f32 %v430_v1, %v365_v60  ;;  %vm534_vm9 = vmand %vm2225_vm12, %vm528_vm4 }
 0x125   : > { %vm2202_vm12 = vcmp.eq.s32.totalorder %v1771_v18, 2 }
 0x126   : > { %v416_v9 = vsel %vm412_vm15, %v414_v0, %v408_v53  ;;  %v1807_v11 = vadd.f32 %v587_v5, %v1792_v63  ;;  %v552_v12 = vrot.slane %v1792_v63, 7  ;;  %v569_v13 = vrot.slane %v1792_v63, 6 }
 0x127   : > { %v423_v16 = vsel %vm1748_vm14, %v416_v9, %v1731_v30  ;;  %v420_v17 = vsel %vm412_vm15, %v408_v53, %v413_v7  ;;  %v415_v20 = vsel %vm412_vm15, %v413_v7, %v414_v0  ;;  %v593_v21 = vadd.f32 %v585_v3, %v1801_v8 }
 0x128   : > { %v426_v22 = vmul.f32 0.5, %v423_v16  ;;  %v421_v23 = vsel %vm1763_vm2, %v420_v17, %v365_v60  ;;  %v422_v24 = vsel %vm1767_vm3, %v415_v20, %v366_v55  ;;  %v641_v25 = vrot.slane %v1807_v11, 7 }
 0x129   : > { %v424_v26 = vmul.f32 0.5, %v421_v23  ;;  %v425_v27 = vmul.f32 0.5, %v422_v24  ;;  %v640_v28 = vrot.slane %v593_v21, 7  ;;  %v656_v29 = vrot.slane %v593_v21, 6 }
 0x12a   : > { %694 = vrot.lane.b32.xlu1 %v426_v22, %s1574_s22  ;;  %v673_v30 = vrot.slane %v593_v21, 5  ;;  %v657_v31 = vrot.slane %v1807_v11, 6  ;;  %v674_v32 = vrot.slane %v1807_v11, 5  ;;  %v554_v33 = vsel %vm412_vm15, %v552_v12, %v547_v57 }
 0x12b   : > { %690 = vrot.lane.b32.xlu0 %v424_v26, %s1574_s22  ;;  %692 = vrot.lane.b32.xlu2 %v425_v27, %s1574_s22  ;;  %v647_v35 = vsel %vm412_vm15, %v636_v61, %v640_v28  ;;  %v663_v37 = vsel %vm567_vm6, %v654_v62, %v656_v29  ;;  %v642_v41 = vsel %vm412_vm15, %v640_v28, %v641_v25  ;;  %v551_v44 = vrot.slane %v1801_v8, 7  ;;  %s1258_s22 = sshll.u32 %s1254_s17, 4  ;;  %s1259_s22 = int_to_ptr.hbm [resolvable:$true] %s1258_s22 }
 0x12c   : > { %v648_v45 = vsel %vm2212_vm7, %v647_v35, %v593_v21  ;;  %v680_v51 = vsel %vm2213_vm10, %v670_v2, %v673_v30  ;;  %v649_v52 = vsel %vm633_vm11, %v642_v41, %v1807_v11  ;;  %v658_v53 = vsel %vm567_vm6, %v656_v29, %v657_v31  ;;  %s1491_s12 = sshra.s32 %s1259_s22, 4  ;;  %s1492_s12 = int_to_ptr.hbm [resolvable:$true] %s1491_s12 }
 0x12d   : > { %v664_v55 = vsel %vm2205_vm13, %v663_v37, %v648_v45  ;;  %v665_v56 = vsel %vm2215_vm1, %v658_v53, %v649_v52  ;;  %v675_v59 = vsel %vm2213_vm10, %v673_v30, %v674_v32  ;;  %v561_v60 = vsel %vm2203_vm8, %v554_v33, %v1736_v34  ;;  %s1493_s13 = scalar_lea.hbm %s1492_s12, 4  ;;  %p1498_p0 = scmp.lt.s32.totalorder %s1492_s12, %s2196_s6 }
 0x12e   : > { %v681_v0 = vsel %vm2204_vm0, %v680_v51, %v664_v55  ;;  %v682_v1 = vsel %vm2207_vm5, %v675_v59, %v665_v56  ;;  %v571_v3 = vsel %vm567_vm6, %v569_v13, %v565_v58  ;;  %v1872_v7 = vsel %vm534_vm9, %v1774_v50, %v1740_v38  ;;  %p1494_p11 = scmp.ne.s32.totalorder %s1492_s12, %s1493_s13 }
 0x12f   : > { %v578_v5 = vsel %vm2202_vm12, %v571_v3, %v561_v60  ;;  %v684_v9 = vmul.f32 0.25, %v681_v0  ;;  %v558_v11 = vsel %vm412_vm15, %v547_v57, %v551_v44  ;;  %v568_v16 = vrot.slane %v1801_v8, 6 }
 0x130   : > { %v685_v17 = vmul.f32 0.25, %v682_v1  ;;  %v581_v20 = vmul.f32 0.33333334, %v578_v5  ;;  %v495_v21 = vmul.u32 3, %v494_v54  ;;  %vm2211_vm4 = vcmp.eq.s32.totalorder %v1872_v7, 1  ;;  %p1495_p12 = pnand %p1494_p11, %p1659_p5 }
 0x131   : > { %v559_v38 = vsel %vm2211_vm4, %v558_v11, %v1801_v8  ;;  %v575_v50 = vsel %vm567_vm6, %v565_v58, %v568_v16  ;;  %vm2206_vm9 = vcmp.eq.s32.totalorder %v1872_v7, 2  ;;  %v643_v54 = vsel %vm412_vm15, %v641_v25, %v636_v61 }
 0x132   : > { %714 = vrot.lane.b32.xlu1 %v684_v9, %s1575_s27  ;;  %v496_v57 = vsub.s32 %v1708_v36, %v495_v21  ;;  %v576_v22 = vsel %vm2206_vm9, %v575_v50, %v559_v38  ;;  %vm2210_vm12 = vcmp.eq.s32.totalorder %v1891_v40, 1  ;;  %v659_v19 = vsel %vm567_vm6, %v657_v31, %v654_v62  ;;  %p1496_p13 = pneg %p1495_p12 }
 0x133   : > { %716 = vrot.lane.b32.xlu0 %v685_v17, %s1575_s27  ;;  %706 = vrot.lane.b32.xlu2 %v581_v20, %s1576_s29  ;;  %v650_v34 = vsel %vm2210_vm12, %v643_v54, %v1758_v46  ;;  %v579_v58 = vmul.f32 0.33333334, %v576_v22  ;;  %vm2208_vm13 = vcmp.eq.s32.totalorder %v1891_v40, 2  ;;  %vm2209_vm5 = vcmp.eq.s32.totalorder %v1891_v40, 3 }
 0x134   : > { %vm529_vm8 = vcmp.ne.s32.totalorder %v496_v57, 0  ;;  %vm532_vm0 = vcmp.lt.s32.totalorder %v496_v57, 0  ;;  %v666_v36 = vsel %vm2208_vm13, %v659_v19, %v650_v34  ;;  %v538_v61 = vadd.s32 3, %v496_v57 }
 0x135   : > { %vm535_vm9 = vmand %vm532_vm0, %vm529_vm8  ;;  %v676_v8 = vsel %vm2213_vm10, %v674_v32, %v670_v2  ;;  %v553_v24 = vsel %vm412_vm15, %v551_v44, %v552_v12  ;;  %v570_v2 = vsel %vm567_vm6, %v568_v16, %v569_v13  ;;  %vm727_vm8 = vcmask 15360  }
 0x136   : > { %v683_v62 = vsel %vm2209_vm5, %v676_v8, %v666_v36  ;;  %v1917_v23 = vsel %vm535_vm9, %v538_v61, %v496_v57  ;;  %vm723_vm9 = vcmask 7168   ;;  %vm731_vm5 = vcmask 23552  }
 0x137   : > { %v686_v25 = vmul.f32 0.25, %v683_v62  ;;  %vm2216_vm13 = vcmp.eq.s32.totalorder %v1917_v23, 1  ;;  %vm2214_vm0 = vcmp.eq.s32.totalorder %v1917_v23, 2  ;;  %vm735_vm12 = vcmask 31744  }
 0x138   : > { %v560_v46 = vsel %vm2216_vm13, %v553_v24, %v1792_v63 }
 0x139   : > { %v577_v26 = vsel %vm2214_vm0, %v570_v2, %v560_v46  ;;  %vm929_vm0 = vcmask 1043456  }
 0x13a   : > { %v580_v27 = vmul.f32 0.33333334, %v577_v26 }
 0x13b   : > { %702 = vrot.lane.b32.xlu2 %v579_v58, %s1576_s29 }
 0x143   : > { %718 = vrot.lane.b32.xlu2 %v686_v25, %s1575_s27  ;;  %s1239_s27 = sshll.u32 %s2092_s11, 4  ;;  %s2142_s27 = int_to_ptr.vmem [resolvable:$true] %s1239_s27 }
 0x14b   : > { %704 = vrot.lane.b32.xlu2 %v580_v27, %s1576_s29  ;;  %s1241_s29 = sshll.u32 %s1238_s19, 4  ;;  %s2144_s29 = int_to_ptr.hbm [resolvable:$true] %s1241_s29 }
 0x185   : > { %v693_v12 = vpop.permute.xlu2 %692 }
 0x186   : > { %v725_v45 = vsel %vm723_vm9, %v1742_v39, %v693_v12 }
 0x18d   : > { %v707_v28 = vpop.permute.xlu2 %706 }
 0x195   : > { %v703_v29 = vpop.permute.xlu2 %702 }
 0x19c   : > { %v695_v30 = vpop.permute.xlu1 %694 }
 0x19d   : > { %v726_v31 = vsel %vm723_vm9, %v1716_v4, %v695_v30  ;;  %v691_v63 = vpop.permute.xlu0 %690  ;;  %v719_v32 = vpop.permute.xlu2 %718 }
 0x19e   : > { %v730_v13 = vsel %vm727_vm8, %v726_v31, %v707_v28  ;;  %v724_v37 = vsel %vm723_vm9, %v1720_v15, %v691_v63 }
 0x19f   : > { %v734_v33 = vsel %vm731_vm5, %v730_v13, %v719_v32  ;;  %v728_v44 = vsel %vm727_vm8, %v724_v37, %v703_v29 }
 0x1a0   : > { %v742_v35 = vsel %vm735_vm12, %v734_v33, -inf }
 0x1a1   : > { %743 = vmax.xlane.f32.xlu2 %v742_v35 }
 0x1a4   : > { %v715_v41 = vpop.permute.xlu1 %714 }
 0x1a5   : > { %v717_v51 = vpop.permute.xlu0 %716  ;;  %v705_v52 = vpop.permute.xlu2 %704  ;;  %v732_v4 = vsel %vm731_vm5, %v728_v44, %v715_v41 }
 0x1a6   : > { %v729_v53 = vsel %vm727_vm8, %v725_v45, %v705_v52  ;;  %v736_v55 = vsel %vm735_vm12, %v732_v4, -inf }
 0x1a7   : > { %737 = vmax.xlane.f32.xlu1 %v736_v55  ;;  %v733_v56 = vsel %vm731_vm5, %v729_v53, %v717_v51 }
 0x1a8   : > { %v739_v59 = vsel %vm735_vm12, %v733_v56, -inf }
 0x1a9   : > { %740 = vmax.xlane.f32.xlu0 %v739_v59 }
 0x214   : > { %v744_v15 = vpop.xlane.xlu2 %743 }
 0x215   : > { %v747_v60 = vsub.f32 %v734_v33, %v744_v15 }
 0x217   : > { %v752_v0 = vmul.f32 1.442695, %v747_v60 }
 0x219   : > { %1453 = vpow2.f32 %v752_v0 }
 0x21a   : > { %v738_v1 = vpop.xlane.xlu1 %737 }
 0x21b   : > { %v745_v39 = vsub.f32 %v732_v4, %v738_v1 }
 0x21c   : > { %v741_v3 = vpop.xlane.xlu0 %740 }
 0x21d   : > { %v748_v5 = vmul.f32 1.442695, %v745_v39  ;;  %v746_v9 = vsub.f32 %v733_v56, %v741_v3 }
 0x21f   : > { %v1454_v11 = vpop.eup %1453  ;;  %1455 = vpow2.f32 %v748_v5  ;;  %v750_v16 = vmul.f32 1.442695, %v746_v9 }
 0x220   : > { %v760_v17 = vsel %vm735_vm12, %v1454_v11, 0.0 }
 0x221   : > { %1457 = vpow2.f32 %v750_v16  ;;  %761 = vadd.xlane.f32.xlu2 %v760_v17 }
 0x225   : > { %v1456_v20 = vpop.eup %1455 }
 0x226   : > { %v754_v21 = vsel %vm735_vm12, %v1456_v20, 0.0 }
 0x227   : > { %v1948_v38 = vpop.eup %1457  ;;  %755 = vadd.xlane.f32.xlu1 %v754_v21 }
 0x228   : > { %v757_v50 = vsel %vm735_vm12, %v1948_v38, 0.0 }
 0x229   : > { %758 = vadd.xlane.f32.xlu0 %v757_v50 }
 0x294   : > { %v762_v54 = vpop.xlane.xlu2 %761 }
 0x295   : > { %1459 = vrcp.f32 %v762_v54  ;;  %v804_v36 = vand.u32 2147483648, %v762_v54  ;;  %v802_v8 = vand.u32 2147483647, %v762_v54  ;;  %vm798_vm8 = vweird.f32 %v762_v54 }
 0x297   : > { %v805_v2 = vor.u32 1.1754944e-38, %v804_v36  ;;  %vm803_vm4 = vcmp.eq.f32.partialorder %v802_v8, 8.507059e+37 }
 0x29a   : > { %v756_v57 = vpop.xlane.xlu1 %755 }
 0x29b   : > { %v1460_v22 = vpop.eup %1459  ;;  %1461 = vrcp.f32 %v756_v57  ;;  %v774_v28 = vand.u32 2147483648, %v756_v57  ;;  %v772_v30 = vand.u32 2147483647, %v756_v57  ;;  %vm768_vm10 = vweird.f32 %v756_v57 }
 0x29c   : > { %v794_v34 = vmul.f32 %v1460_v22, %v762_v54  ;;  %v759_v19 = vpop.xlane.xlu0 %758  ;;  %vm799_vm5 = vweird.f32 %v1460_v22 }
 0x29d   : > { %1463 = vrcp.f32 %v759_v19  ;;  %vm800_vm9 = vmor %vm798_vm8, %vm799_vm5  ;;  %v789_v13 = vand.u32 2147483648, %v759_v19  ;;  %v787_v33 = vand.u32 2147483647, %v759_v19  ;;  %vm783_vm8 = vweird.f32 %v759_v19 }
 0x29e   : > { %v795_v58 = vsub.f32 1.0, %v794_v34  ;;  %vm773_vm1 = vcmp.eq.f32.partialorder %v772_v30, 8.507059e+37  ;;  %v775_v44 = vor.u32 1.1754944e-38, %v774_v28 }
 0x29f   : > { %v790_v55 = vor.u32 1.1754944e-38, %v789_v13  ;;  %vm788_vm13 = vcmp.eq.f32.partialorder %v787_v33, 8.507059e+37 }
 0x2a0   : > { %v796_v61 = vmul.f32 %v1460_v22, %v795_v58 }
 0x2a1   : > { %v1462_v62 = vpop.eup %1461 }
 0x2a2   : > { %v764_v24 = vmul.f32 %v1462_v62, %v756_v57  ;;  %v797_v25 = vadd.f32 %v1460_v22, %v796_v61  ;;  %vm769_vm7 = vweird.f32 %v1462_v62 }
 0x2a3   : > { %v1464_v46 = vpop.eup %1463 }
 0x2a4   : > { %v765_v26 = vsub.f32 1.0, %v764_v24  ;;  %v779_v27 = vmul.f32 %v1464_v46, %v759_v19  ;;  %v801_v12 = vsel %vm800_vm9, %v1460_v22, %v797_v25  ;;  %vm784_vm5 = vweird.f32 %v1464_v46  ;;  %vm770_vm9 = vmor %vm768_vm10, %vm769_vm7 }
 0x2a5   : > { %v806_v29 = vsel %vm803_vm4, %v805_v2, %v801_v12  ;;  %vm785_vm4 = vmor %vm783_vm8, %vm784_vm5 }
 0x2a6   : > { %v766_v31 = vmul.f32 %v1462_v62, %v765_v26  ;;  %v780_v63 = vsub.f32 1.0, %v779_v27  ;;  %v807_v32 = vmul.f32 %v1454_v11, %v806_v29 }
 0x2a8   : > { %v781_v35 = vmul.f32 %v1464_v46, %v780_v63  ;;  %810 = vst.msk [vmem:[#allocation3 + $0x10] sm:$0xff] %vm735_vm12, %v807_v32  ;;  %v812_v37 = vpack.c.bf16 %v807_v32, %v807_v32  ;;  %v767_v41 = vadd.f32 %v1462_v62, %v766_v31 }
 0x2aa   : > { %v828_v45 = vsel %vm735_vm12, %v812_v37, 0  ;;  %v930_v51 = vsel %vm929_vm0, %v812_v37, 0  ;;  %v771_v52 = vsel %vm770_vm9, %v1462_v62, %v767_v41  ;;  %v782_v4 = vadd.f32 %v1464_v46, %v781_v35 }
 0x2ab   : > { %836 = vmatpush.bf16.xpose.msra.mxu1 %v828_v45  ;;  %1378 = vmatpush.bf16.xpose.msra.mxu3 %v828_v45  ;;  %v776_v53 = vsel %vm773_vm1, %v775_v44, %v771_v52  ;;  %vm848_vm1 = vcmask 195584  }
 0x2ac   : > { %938 = vmatpush.bf16.msra.mxu2 %v930_v51  ;;  %v777_v56 = vmul.f32 %v1456_v20, %v776_v53  ;;  %v786_v59 = vsel %vm785_vm4, %v1464_v46, %v782_v4 }
 0x2ad   : > { %v791_v15 = vsel %vm788_vm13, %v790_v55, %v786_v59 }
 0x2ae   : > { %v792_v60 = vmul.f32 %v1948_v38, %v791_v15  ;;  %808 = vst.msk [vmem:[#allocation3] sm:$0xff] %vm735_vm12, %v777_v56 }
 0x2af   : > { %v815_v3 = vld [vmem:[#allocation3 + $0x10] sm:$0xff] }
 0x2b0   : > { %809 = vst.msk [vmem:[#allocation3 + $0x8] sm:$0xff] %vm735_vm12, %v792_v60  ;;  %v811_v0 = vpack.c.bf16 %v792_v60, %v777_v56  ;;  %v817_v11 = vpack.c.bf16 %v815_v3, %v815_v3 }
 0x2b2   : > { %939 = vmatpush.bf16.msra.mxu2 %v811_v0  ;;  %v825_v1 = vsel %vm735_vm12, %v811_v0, 0 }
 0x2b3   : > { %837 = vmatpush.bf16.xpose.msra.mxu1 %v825_v1  ;;  %1379 = vmatpush.bf16.xpose.msra.mxu3 %v825_v1 }
 0x2b5   : > { %v813_v39 = vld [vmem:[#allocation3] sm:$0xff] }
 0x2b7   : > { %v814_v5 = vld [vmem:[#allocation3 + $0x8] sm:$0xff] }
 0x2b8   : > { %v816_v9 = vpack.c.bf16 %v814_v5, %v813_v39 }
 0x2ba   : > { %1367 = vmatmul.msk.bf16.vlgmr.msra.gmra.mxu1 %vm735_vm12, %v816_v9  ;;  %1368 = vmatmul.msk.bf16.vlgmr.msra.gmra.mxu3 %vm735_vm12, %v817_v11 }
 0x337   : > { %v839_v16 = vpop.f32.mrf.mxu1 }
 0x338   : > { %v849_v17 = vsel %vm848_vm1, %v839_v16, -inf }
 0x339   : > { %850 = vmax.xlane.f32.xlu2 %v849_v17 }
 0x33d   : > { %v844_v20 = vpop.f32.mrf.mxu3 }
 0x33e   : > { %v855_v21 = vsel %vm848_vm1, %v844_v20, -inf }
 0x33f   : > { %v841_v38 = vpop.f32.mrf.mxu1  ;;  %856 = vmax.xlane.f32.xlu0 %v855_v21 }
 0x340   : > { %v852_v50 = vsel %vm848_vm1, %v841_v38, -inf }
 0x341   : > { %853 = vmax.xlane.f32.xlu1 %v852_v50 }
 0x345   : > { %v846_v54 = vpop.f32.mrf.mxu3 }
 0x3ac   : > { %v851_v57 = vpop.xlane.xlu2 %850 }
 0x3ad   : > { %v858_v22 = vsub.f32 %v839_v16, %v851_v57 }
 0x3af   : > { %v861_v34 = vmul.f32 1.442695, %v858_v22  ;;  %v1577_v22 = vmov 2  }
 0x3b0   : > { %1441 = vset.pattern.permute.xlu1 %v1577_v22 }
 0x3b1   : > { %1465 = vpow2.f32 %v861_v34  ;;  %v1578_v34 = vmov 1  }
 0x3b2   : > { %v857_v19 = vpop.xlane.xlu0 %856  ;;  %1440 = vset.pattern.permute.xlu0 %v1578_v34 }
 0x3b3   : > { %v860_v58 = vsub.f32 %v844_v20, %v857_v19  ;;  %v270_v19 = vld [vmem:[%s1677_s16 + $0x8] sm:$0xf]  ;;  %s1497_s16 = scalar_lea.hbm %s2196_s6, 8 }
 0x3b4   : > { %v854_v36 = vpop.xlane.xlu1 %853  ;;  %p1499_p1 = scmp.lt.s32.totalorder %s1497_s16, %s1493_s13 }
 0x3b5   : > { %v865_v61 = vmul.f32 1.442695, %v860_v58  ;;  %v859_v8 = vsub.f32 %v841_v38, %v854_v36  ;;  %v282_v58 = vunpack.c.l.b16 %v270_v19 }
 0x3b6   : > { %p1500_p2 = por %p1499_p1, %p1498_p0 }
 0x3b7   : > { %v1466_v62 = vpop.eup %1465  ;;  %1467 = vpow2.f32 %v865_v61  ;;  %v863_v24 = vmul.f32 1.442695, %v859_v8  ;;  %v284_v36 = vpack.c.b16 %v282_v58, %v282_v58 }
 0x3b8   : > { %v867_v25 = vsel %vm848_vm1, %v1466_v62, 0.0  ;;  %p1501_p3 = pnand %p1500_p2, %p1496_p13 }
 0x3b9   : > { %1469 = vpow2.f32 %v863_v24  ;;  %868 = vadd.xlane.f32.xlu2 %v867_v25 }
 0x3bd   : > { %v1468_v46 = vpop.eup %1467 }
 0x3be   : > { %v873_v2 = vsel %vm848_vm1, %v1468_v46, 0.0 }
 0x3bf   : > { %v1470_v26 = vpop.eup %1469  ;;  %874 = vadd.xlane.f32.xlu0 %v873_v2 }
 0x3c0   : > { %v870_v27 = vsel %vm848_vm1, %v1470_v26, 0.0 }
 0x3c1   : > { %871 = vadd.xlane.f32.xlu1 %v870_v27  ;;  %v978_v27 = vrot.slane %v1693_v14, 1 }
 0x42c   : > { %v869_v12 = vpop.xlane.xlu2 %868 }
 0x42d   : > { %1471 = vrcp.f32 %v869_v12  ;;  %v887_v41 = vand.u32 2147483648, %v869_v12  ;;  %vm881_vm10 = vweird.f32 %v869_v12  ;;  %v885_v44 = vand.u32 2147483647, %v869_v12 }
 0x42f   : > { %v888_v56 = vor.u32 1.1754944e-38, %v887_v41  ;;  %vm886_vm5 = vcmp.eq.f32.partialorder %v885_v44, 8.507059e+37 }
 0x432   : > { %v875_v28 = vpop.xlane.xlu0 %874 }
 0x433   : > { %v1472_v29 = vpop.eup %1471  ;;  %1473 = vrcp.f32 %v875_v28  ;;  %v917_v17 = vand.u32 2147483648, %v875_v28  ;;  %v915_v20 = vand.u32 2147483647, %v875_v28 }
 0x434   : > { %v877_v30 = vmul.f32 %v1472_v29, %v869_v12  ;;  %v872_v31 = vpop.xlane.xlu1 %871  ;;  %vm882_vm7 = vweird.f32 %v1472_v29  ;;  %v977_v12 = vrot.slane %v1689_v10, 1 }
 0x435   : > { %1475 = vrcp.f32 %v872_v31  ;;  %vm883_vm13 = vmor %vm881_vm10, %vm882_vm7  ;;  %v902_v52 = vand.u32 2147483648, %v872_v31  ;;  %v900_v53 = vand.u32 2147483647, %v872_v31  ;;  %vm896_vm8 = vweird.f32 %v872_v31 }
 0x436   : > { %v878_v63 = vsub.f32 1.0, %v877_v30  ;;  %vm911_vm10 = vweird.f32 %v875_v28  ;;  %v918_v38 = vor.u32 1.1754944e-38, %v917_v17 }
 0x437   : > { %v903_v60 = vor.u32 1.1754944e-38, %v902_v52  ;;  %vm901_vm4 = vcmp.eq.f32.partialorder %v900_v53, 8.507059e+37  ;;  %v1108_v52 = vrot.slane %v1689_v10, 3 }
 0x438   : > { %v879_v32 = vmul.f32 %v1472_v29, %v878_v63 }
 0x439   : > { %v1474_v13 = vpop.eup %1473 }
 0x43a   : > { %v880_v35 = vadd.f32 %v1472_v29, %v879_v32  ;;  %v907_v45 = vmul.f32 %v1474_v13, %v875_v28  ;;  %vm912_vm7 = vweird.f32 %v1474_v13  ;;  %v1580_v28 = vmov 0.0  }
 0x43b   : > { %v1476_v33 = vpop.eup %1475 }
 0x43c   : > { %v892_v37 = vmul.f32 %v1476_v33, %v872_v31  ;;  %vm897_vm0 = vweird.f32 %v1476_v33  ;;  %v884_v55 = vsel %vm883_vm13, %v1472_v29, %v880_v35  ;;  %v908_v59 = vsub.f32 1.0, %v907_v45  ;;  %vm913_vm13 = vmor %vm911_vm10, %vm912_vm7 }
 0x43d   : > { %vm898_vm9 = vmor %vm896_vm8, %vm897_vm0  ;;  %v889_v0 = vsel %vm886_vm5, %v888_v56, %v884_v55  ;;  %vm916_vm0 = vcmp.eq.f32.partialorder %v915_v20, 8.507059e+37  ;;  %vm2226_vm5 = vcmask 130048   ;;  %v980_v29 = vrot.slane %v1580_v28, 1 }
 0x43e   : > { %v893_v51 = vsub.f32 1.0, %v892_v37  ;;  %v909_v3 = vmul.f32 %v1474_v13, %v908_v59  ;;  %v890_v5 = vmul.f32 %v1466_v62, %v889_v0  ;;  %1366 = vmatmul.msk.bf16.gmra.mxu0 %vm2226_vm5, %v284_v36  ;;  %v1036_v35 = vrot.slane %v1580_v28, 2 }
 0x43f   : > { %v1109_v37 = vrot.slane %v1693_v14, 3  ;;  %vm2229_vm8 = vcmask 1045504   ;;  %vm2236_vm5 = vcmp.eq.s32.totalorder %v1917_v23, 1 }
 0x440   : > { %v894_v4 = vmul.f32 %v1476_v33, %v893_v51  ;;  %v910_v16 = vadd.f32 %v1474_v13, %v909_v3 }
 0x442   : > { %v895_v15 = vadd.f32 %v1476_v33, %v894_v4  ;;  %v914_v21 = vsel %vm913_vm13, %v1474_v13, %v910_v16  ;;  %v1111_v4 = vrot.slane %v1580_v28, 3  ;;  %vm2234_vm13 = vmmov %vm2229_vm8 }
 0x443   : > { %v919_v50 = vsel %vm916_vm0, %v918_v38, %v914_v21 }
 0x444   : > { %v899_v1 = vsel %vm898_vm9, %v1476_v33, %v895_v15  ;;  %v920_v54 = vmul.f32 %v1468_v46, %v919_v50  ;;  %v1033_v33 = vrot.slane %v1689_v10, 2  ;;  %vm2230_vm9 = vmmov %vm2229_vm8 }
 0x445   : > { %v904_v39 = vsel %vm901_vm4, %v903_v60, %v899_v1  ;;  %vm2231_vm4 = vcmask 1044480  }
 0x446   : > { %v905_v9 = vmul.f32 %v1470_v26, %v904_v39  ;;  %v922_v57 = vpack.c.bf16 %v920_v54, %v920_v54  ;;  %v1579_v26 = vmov 3   ;;  %v1110_v55 = vsel %vm2231_vm4, %v1108_v52, %v1109_v37  ;;  %vm2232_vm7 = vmmov %vm2231_vm4 }
 0x447   : > { %v1112_v56 = vsel %vm2232_vm7, %v1109_v37, %v1111_v4  ;;  %v1042_v15 = vsel %vm2234_vm13, %v1036_v35, %v1033_v33  ;;  %vm2235_vm0 = vmmov %vm2231_vm4  ;;  %vm2244_vm4 = vcmp.eq.s32.totalorder %v1872_v7, 2  ;;  %vm2247_vm13 = vcmask 261120  }
 0x448   : > { %v921_v11 = vpack.c.bf16 %v905_v9, %v890_v5  ;;  %v1117_v20 = vsel %vm2235_vm0, %v1111_v4, %v1108_v52  ;;  %vm2248_vm0 = vmmov %vm2247_vm13 }
 0x44a   : > { %1369 = vmatmul.msk.bf16.vlgmr.msra.gmra.mxu2 %vm848_vm1, %v921_v11 }
 0x45a   : > { %1370 = vmatmul.msk.bf16.gmra.mxu2 %vm848_vm1, %v922_v57 }
 0x4bb   : > { %v312_v1 = vpop.f32.mrf.mxu0 }
 0x4cd   : > { %v941_v61 = vpop.f32.mrf.mxu2 }
 0x4ce   : > { %950 = vst.msk [vmem:[#allocation4] sm:$0xff] %vm735_vm12, %v941_v61  ;;  %v314_v61 = vpop.f32.mrf.mxu0 }
 0x4d5   : > { %v943_v8 = vpop.f32.mrf.mxu2  ;;  %v953_v62 = vld [vmem:[#allocation4] sm:$0xff] }
 0x4d6   : > { %951 = vst.msk [vmem:[#allocation4 + $0x8] sm:$0xff] %vm735_vm12, %v943_v8  ;;  %1091 = vperm.xlu1 %1441, %v953_v62   ;;  %958 = vperm.xlu2 %1439, %v953_v62  }
 0x4d7   : > { %1016 = vperm.xlu0 %1440, %v953_v62  }
 0x4dd   : > { %v946_v24 = vpop.f32.mrf.mxu2  ;;  %v954_v25 = vld [vmem:[#allocation4 + $0x8] sm:$0xff] }
 0x4de   : > { %952 = vst.msk [vmem:[#allocation4 + $0x10] sm:$0xff] %vm735_vm12, %v946_v24  ;;  %1442 = vset.pattern.permute.xlu1 %v1573_v6  ;;  %1444 = vset.pattern.permute.xlu2 %v1578_v34  ;;  %vm2227_vm12 = vcmask 1046528  }
 0x4df   : > { %1020 = vperm.xlu2 %1444, %v954_v25   ;;  %963 = vperm.xlu1 %1442, %v954_v25   ;;  %v979_v31 = vsel %vm2227_vm12, %v977_v12, %v978_v27  ;;  %vm2228_vm1 = vmmov %vm2227_vm12  ;;  %vm2238_vm12 = vcmp.eq.s32.totalorder %v1917_v23, 2 }
 0x4e0   : > { %v981_v63 = vsel %vm2228_vm1, %v978_v27, %v980_v29  ;;  %v1983_v32 = vadd.f32 %v979_v31, %v1689_v10  ;;  %vm2233_vm10 = vmmov %vm2228_vm1  ;;  %vm2240_vm1 = vcmp.eq.s32.totalorder %v1753_v43, 1 }
 0x4e1   : > { %v1986_v13 = vadd.f32 %v981_v63, %v1693_v14  ;;  %v2000_v59 = vsel %vm2233_vm10, %v980_v29, %v977_v12  ;;  %vm2246_vm10 = vcmp.eq.s32.totalorder %v1753_v43, 3 }
 0x4e2   : > { %v2009_v39 = vadd.f32 %v1042_v15, %v2000_v59  ;;  %v995_v16 = vrot.slane %v1983_v32, 7  ;;  %v991_v36 = vrot.slane %v2000_v59, 7 }
 0x4e3   : > { %v996_v17 = vrot.slane %v1986_v13, 7 }
 0x4e4   : > { %v2020_v50 = vadd.f32 %v1117_v20, %v2009_v39  ;;  %v1002_v24 = vsel %vm412_vm15, %v991_v36, %v995_v16  ;;  %v1068_v49 = vrot.slane %v2009_v39, 6 }
 0x4e5   : > { %v948_v46 = vpop.f32.mrf.mxu2  ;;  %v955_v2 = vld [vmem:[#allocation4 + $0x10] sm:$0xff]  ;;  %v997_v8 = vsel %vm412_vm15, %v995_v16, %v996_v17 }
 0x4e6   : > { %1024 = vperm.xlu0 %1440, %v955_v2   ;;  %v1010_v29 = vsel %vm1767_vm3, %v997_v8, %v1986_v13  ;;  %vm2239_vm3 = vcmask 1042432  }
 0x4e7   : > { %1445 = vset.pattern.permute.xlu2 %v1577_v22  ;;  %1443 = vset.pattern.permute.xlu1 %v1579_v26  ;;  %vm2245_vm7 = vmmov %vm2239_vm3 }
 0x4e8   : > { %1095 = vperm.xlu2 %1445, %v954_v25   ;;  %1185 = vperm.xlu1 %1443, %v953_v62   ;;  %v1047_v62 = vrot.slane %v2009_v39, 7 }
 0x4ee   : > { %1450 = vset.pattern.permute.xlu0 %v1579_v26 }
 0x4f0   : > { %1446 = vset.pattern.permute.xlu2 %v1579_v26  ;;  %1447 = vset.pattern.permute.xlu1 %v1573_v6  ;;  %v1034_v6 = vrot.slane %v1693_v14, 2 }
 0x4f1   : > { %1189 = vperm.xlu2 %1446, %v954_v25   ;;  %968 = vperm.xlu1 %1447, %v955_v2  }
 0x4f2   : > { %v1037_v41 = vsel %vm2229_vm8, %v1034_v6, %v1036_v35  ;;  %v1035_v44 = vsel %vm2230_vm9, %v1033_v33, %v1034_v6  ;;  %v1009_v6 = vsel %vm1763_vm2, %v1002_v24, %v1983_v32  ;;  %v1143_v35 = vrot.slane %v2020_v50, 6 }
 0x4f3   : > { %v1993_v45 = vadd.f32 %v1037_v41, %v1986_v13  ;;  %v1043_v51 = vadd.f32 %v1035_v44, %v1983_v32  ;;  %v1013_v41 = vmul.f32 0.5, %v1010_v29  ;;  %vm2241_vm2 = vcmp.eq.s32.totalorder %v1872_v7, 1 }
 0x4f4   : > { %vm2242_vm8 = vcmp.eq.s32.totalorder %v1761_v47, 3  ;;  %vm2243_vm9 = vcmp.eq.s32.totalorder %v1753_v43, 2 }
 0x4f5   : > { %v2003_v60 = vadd.f32 %v1110_v55, %v1043_v51  ;;  %v2006_v0 = vadd.f32 %v1112_v56, %v1993_v45  ;;  %v1051_v9 = vrot.slane %v1043_v51, 7  ;;  %v1052_v11 = vrot.slane %v1993_v45, 7 }
 0x4f6   : > { %v1070_v54 = vrot.slane %v1043_v51, 6  ;;  %v1071_v57 = vrot.slane %v1993_v45, 6  ;;  %v1012_v55 = vmul.f32 0.5, %v1009_v6 }
 0x4f7   : > { %v1126_v3 = vrot.slane %v2003_v60, 7  ;;  %v1127_v5 = vrot.slane %v2006_v0, 7  ;;  %v1145_v21 = vrot.slane %v2003_v60, 6  ;;  %v1146_v38 = vrot.slane %v2006_v0, 6 }
 0x4f8   : > { %v1053_v19 = vsel %vm412_vm15, %v1051_v9, %v1052_v11  ;;  %v1072_v27 = vsel %vm567_vm6, %v1070_v54, %v1071_v57  ;;  %v1164_v12 = vrot.slane %v2003_v60, 5  ;;  %v1165_v28 = vrot.slane %v2006_v0, 5 }
 0x4f9   : > { %1448 = vset.pattern.permute.xlu2 %v1577_v22  ;;  %1449 = vset.pattern.permute.xlu1 %v1579_v26  ;;  %v1128_v34 = vsel %vm412_vm15, %v1126_v3, %v1127_v5  ;;  %v1147_v46 = vsel %vm567_vm6, %v1145_v21, %v1146_v38  ;;  %v1066_v26 = vsel %vm2236_vm5, %v1053_v19, %v1993_v45  ;;  %vm2249_vm5 = vmmov %vm2248_vm0 }
 0x4fa   : > { %1099 = vperm.xlu2 %1448, %v955_v2   ;;  %1193 = vperm.xlu1 %1449, %v955_v2   ;;  %v1141_v25 = vsel %vm633_vm11, %v1128_v34, %v2006_v0  ;;  %v1122_v2 = vrot.slane %v2020_v50, 7  ;;  %v1058_v63 = vsel %vm412_vm15, %v1047_v62, %v1051_v9  ;;  %vm2237_vm11 = vcmp.eq.s32.totalorder %v1761_v47, 2 }
 0x4fb   : > { %v1160_v33 = vsel %vm2237_vm11, %v1147_v46, %v1141_v25  ;;  %v1085_v37 = vsel %vm2238_vm12, %v1072_v27, %v1066_v26  ;;  %v1166_v52 = vsel %vm2239_vm3, %v1164_v12, %v1165_v28  ;;  %v1152_v32 = vsel %vm567_vm6, %v1143_v35, %v1145_v21  ;;  %vm2250_vm11 = vmmov %vm2248_vm0 }
 0x4fc   : > { %v1133_v31 = vsel %vm412_vm15, %v1122_v2, %v1126_v3  ;;  %v1065_v4 = vsel %vm2241_vm2, %v1058_v63, %v1043_v51  ;;  %v1077_v23 = vsel %vm567_vm6, %v1068_v49, %v1070_v54  ;;  %v1179_v56 = vsel %vm2242_vm8, %v1166_v52, %v1160_v33 }
 0x4fd   : > { %v1140_v48 = vsel %vm2240_vm1, %v1133_v31, %v2003_v60  ;;  %v1088_v3 = vmul.f32 0.33333334, %v1085_v37  ;;  %v1162_v51 = vrot.slane %v2020_v50, 5  ;;  %v1084_v47 = vsel %vm2244_vm4, %v1077_v23, %v1065_v4  ;;  %vm2255_vm1 = vmmov %vm2245_vm7 }
 0x4fe   : > { %v1159_v20 = vsel %vm2243_vm9, %v1152_v32, %v1140_v48  ;;  %v1182_v54 = vmul.f32 0.25, %v1179_v56  ;;  %v1087_v24 = vmul.f32 0.33333334, %v1084_v47  ;;  %v998_v27 = vsel %vm412_vm15, %v996_v17, %v991_v36 }
 0x4ff   : > { %v1171_v19 = vsel %vm2245_vm7, %v1162_v51, %v1164_v12  ;;  %v1054_v12 = vsel %vm412_vm15, %v1052_v11, %v1047_v62  ;;  %v1011_v29 = vsel %vm1748_vm14, %v998_v27, %v2000_v59  ;;  %vm2251_vm12 = vcmp.eq.s32.totalorder %v1891_v40, 1 }
 0x500   : > { %v1178_v8 = vsel %vm2246_vm10, %v1171_v19, %v1159_v20  ;;  %v1148_v17 = vsel %vm567_vm6, %v1146_v38, %v1143_v35  ;;  %vm2252_vm3 = vcmp.eq.s32.totalorder %v1771_v18, 1  ;;  %v1073_v11 = vsel %vm567_vm6, %v1071_v57, %v1068_v49 }
 0x501   : > { %v1181_v26 = vmul.f32 0.25, %v1178_v8  ;;  %v1014_v42 = vmul.f32 0.5, %v1011_v29  ;;  %vm2253_vm14 = vcmp.eq.s32.totalorder %v1891_v40, 2  ;;  %v1167_v45 = vsel %vm2255_vm1, %v1165_v28, %v1162_v51 }
 0x502   : > { %vm2256_vm6 = vcmp.eq.s32.totalorder %v1891_v40, 3  ;;  %vm1219_vm2 = vcmask 257024  }
 0x530   : > { %v1977_v30 = vpop.permute.xlu2 %958 }
 0x539   : > { %v1021_v53 = vpop.permute.xlu2 %1020 }
 0x53a   : > { %v1028_v1 = vmul.f32 %v1021_v53, %v1013_v41  ;;  %v971_v53 = vmul.f32 %v1977_v30, %v1689_v10 }
 0x542   : > { %v1096_v58 = vpop.permute.xlu2 %1095 }
 0x543   : > { %v1103_v21 = vmul.f32 %v1096_v58, %v1088_v3 }
 0x548   : > { %v1092_v22 = vpop.permute.xlu1 %1091 }
 0x549   : > { %v1017_v44 = vpop.permute.xlu0 %1016  ;;  %v1102_v58 = vmul.f32 %v1092_v22, %v1087_v24  ;;  %v1129_v22 = vsel %vm412_vm15, %v1127_v5, %v1122_v2  ;;  %v1067_v5 = vsel %vm2252_vm3, %v1054_v12, %v2009_v39  ;;  %vm2254_vm15 = vcmp.eq.s32.totalorder %v1771_v18, 2 }
 0x54a   : > { %v1027_v60 = vmul.f32 %v1017_v44, %v1012_v55  ;;  %v1142_v13 = vsel %vm2251_vm12, %v1129_v22, %v2020_v50  ;;  %v1086_v38 = vsel %vm2254_vm15, %v1073_v11, %v1067_v5 }
 0x54b   : > { %v1190_v16 = vpop.permute.xlu2 %1189  ;;  %v1161_v50 = vsel %vm2253_vm14, %v1148_v17, %v1142_v13  ;;  %v1089_v18 = vmul.f32 0.33333334, %v1086_v38 }
 0x54c   : > { %v1030_v25 = vadd.f32 %v1027_v60, %v971_v53  ;;  %v1180_v6 = vsel %vm2256_vm6, %v1167_v45, %v1161_v50 }
 0x54d   : > { %v1183_v49 = vmul.f32 0.25, %v1180_v6 }
 0x54e   : > { %v1105_v10 = vadd.f32 %v1102_v58, %v1030_v25 }
 0x551   : > { %v964_v15 = vpop.permute.xlu1 %963 }
 0x552   : > { %v972_v9 = vmul.f32 %v964_v15, %v1693_v14  ;;  %v1197_v14 = vmul.f32 %v1190_v16, %v1182_v54 }
 0x554   : > { %v1031_v34 = vadd.f32 %v1028_v1, %v972_v9  ;;  %v1100_v63 = vpop.permute.xlu2 %1099 }
 0x555   : > { %v1104_v28 = vmul.f32 %v1100_v63, %v1089_v18 }
 0x556   : > { %v1106_v61 = vadd.f32 %v1103_v21, %v1031_v34 }
 0x558   : > { %v1200_v46 = vadd.f32 %v1197_v14, %v1106_v61  ;;  %v1025_v62 = vpop.permute.xlu0 %1024 }
 0x559   : > { %v1029_v39 = vmul.f32 %v1025_v62, %v1014_v42 }
 0x55a   : > { %1203 = vst.msk [vmem:[#allocation2 + $0x8] sm:$0xff] %vm2247_vm13, %v1200_v46  ;;  %v1186_v7 = vpop.permute.xlu1 %1185 }
 0x55b   : > { %1206 = vst.msk [vmem:[%s2092_s11 + $0x8] sm:$0xff] %vm2248_vm0, %v1200_v46  ;;  %v1196_v30 = vmul.f32 %v1186_v7, %v1181_v26 }
 0x55d   : > { %v1199_v43 = vadd.f32 %v1196_v30, %v1105_v10 }
 0x55f   : > { %1202 = vst.msk [vmem:[#allocation2] sm:$0xff] %vm2249_vm5, %v1199_v43 }
 0x560   : > { %1205 = vst.msk [vmem:[%s2092_s11] sm:$0xff] %vm2250_vm11, %v1199_v43 }
 0x563   : > { %v969_v36 = vpop.permute.xlu1 %968 }
 0x564   : > { %v973_v59 = vmul.f32 0.0, %v969_v36 }
 0x566   : > { %v1208_v2 = vld [vmem:[#allocation2] ss:$4 sm:$0xf]  ;;  %v1210_v31 = vld [vmem:[#allocation2 + $0x1] ss:$4 sm:$0xf]  ;;  %v1032_v35 = vadd.f32 %v1029_v39, %v973_v59 }
 0x567   : > { %v1211_v57 = vadd.f32 %v1210_v31, %v1208_v2  ;;  %v1213_v33 = vld [vmem:[#allocation2 + $0x2] ss:$4 sm:$0xf]  ;;  %v1216_v37 = vld [vmem:[#allocation2 + $0x3] ss:$4 sm:$0xf] }
 0x568   : > { %v1107_v40 = vadd.f32 %v1104_v28, %v1032_v35 }
 0x569   : > { %v1214_v0 = vadd.f32 %v1213_v33, %v1211_v57 }
 0x56b   : > { %v1217_v41 = vadd.f32 %v1216_v37, %v1214_v0 }
 0x56c   : > { %v1194_v44 = vpop.permute.xlu1 %1193 }
 0x56d   : > { %v1198_v52 = vmul.f32 %v1194_v44, %v1183_v49  ;;  %v1218_v48 = vmul.f32 0.25, %v1217_v41 }
 0x56f   : > { %v1201_v32 = vadd.f32 %v1198_v52, %v1107_v40  ;;  %1220 = vst.msk [vmem:[%s257_s20] sm:$0xf] %vm1219_vm2, %v1218_v48 }
 0x570   : > { %1504 = shalt.err (!%p1501_p3)
}
 0x571   : > { %1386 = dma.vmem_to_hbm [thread:$0]  (%p1659_p5), %s1257_s21, 64, %s1259_s22, %s1227_s10   ;;  %vm2257_vm8 = vmmov %vm2248_vm0 }
 0x572   : > { %1207 = vst.msk [vmem:[%s2092_s11 + $0x10] sm:$0xff] %vm2257_vm8, %v1201_v32  ;;  %s1222_s18 = scalar_lea.sflag [#allocation7], %s2077_s30  ;;  %s1519_s19 = sshra.s32 %s2144_s29, 4  ;;  %s1520_s19 = int_to_ptr.hbm [resolvable:$true] %s1519_s19 }
 0x573   : > { %s1521_s20 = scalar_lea.hbm %s1520_s19, 24  ;;  %s1525_s14 = scalar_lea.hbm %s2195_s5, 48 }
 0x574   : > { %p1522_p4 = scmp.ne.s32.totalorder %s1520_s19, %s1521_s20  ;;  %p1526_p9 = scmp.lt.s32.totalorder %s1520_s19, %s2195_s5 }
 0x575   : > { %p1527_p10 = scmp.lt.s32.totalorder %s1525_s14, %s1521_s20 }
 0x576   : > { %p1523_p7 = pnand %p1522_p4, %p1659_p5 }
 0x577   : > { %p1528_p11 = por %p1527_p10, %p1526_p9 }
 0x578   : > { %p1524_p8 = pneg %p1523_p7 }
 0x57a   : > { %p1529_p12 = pnand %p1528_p11, %p1524_p8 }
 0x57c   : > { %1532 = shalt.err (!%p1529_p12)
}
 0x57d   : > { %s1581_s30 = smov 128   ;;  %s1582_s11 = smov 8  }
 0x57e   : > { %1385 = dma.vmem_to_hbm [thread:$0]  (%p1659_p5), %s2142_s27, 384, %s2144_s29, %s1222_s18, %s1581_s30, %s1581_s30, %s1582_s11  }
 0x57f PF: > { %p1396_p13 = scmp.ge.s32.totalorder %s1571_s26, 2  ;;  %s1270_s21 = sand.u32 1, %s1559_s23  }
 0x580   : > { %s1271_s22 = scalar_lea.sflag [#allocation7], %s1270_s21 }
 0x581   : > { %p1390_p0 = pnand %p1396_p13, %p1663_p6 }
 0x583   : > { %p1391_p1 = pneg %p1390_p0 }
 0x585   : > { %1550 = dma.done.wait (%p1391_p1), %s1271_s22, 384  }
 0x586   : > { %1552 = vsyncadd (%p1391_p1), %s1271_s22, 4294966912  ;;  %s1281_s10 = scalar_lea.sflag [#allocation9], %s1270_s21 }
 0x587   : > { %1554 = dma.done.wait (%p1391_p1), %s1281_s10, 64  }
 0x588   : > { %1556 = vsyncadd (%p1391_p1), %s1281_s10, 4294967232  ;;  %p22_p5 = scmp.ge.s32.totalorder %s1646_s28, 4   ;;  %s2258_s23 = smov %s1563_s24 }
 0x589   : > { %s2259_s24 = smov %s1567_s25  ;;  %s2260_s25 = smov %s1657_s7 }
 0x58a   : > { %s2261_s26 = smov %s1646_s28  ;;  %24 = sbr.rel (!%p22_p5) target bundleno = 8 (0x8), region = 95 }
 0x58f   :  { %1287 = vsyncpa [#allocation7], 1 }
 0x590   :  { %1289 = vsyncpa [#allocation7 + $0x1], 1 }
 0x591   :  { %1290 = vsyncpa [#allocation9], 1 }
 0x592   :  { %1292 = vsyncpa [#allocation9 + $0x1], 1 }

</bundles_post_ra>
